<compile_context>
chip_gen: v6e
topology: v6e:2x2x1
jax: 0.10.0
libtpu: 0.0.40
codegen_flags: <defaults>
</compile_context>

<pallas_src>
import functools

import jax
import jax.numpy as jnp
import numpy as np
from jax.experimental import pallas as pl
from jax.experimental.pallas import tpu as pltpu

LANE = 128  # TPU vreg lane width


def _cdiv(a, b):
    return -(-a // b)


def _round_up(v, m):
    return ((v + m - 1) // m) * m


def _meta_conv_kernel(meta_ref, x_ref, wcat_ref, out_ref, gen_ref, *,
                      C, O_PAD, K, T_OUT):
    """One grid step = GB groups (GB a multiple of 128), groups in the lane dim.

    meta_ref : [M+1, GB]        meta vectors (+ constant-1 row), groups in lanes
    x_ref    : [C, T_in, GB]    input signal, groups in lanes
    wcat_ref : [R, M+1]         fused hyper-net matrix; R = (C*K+1)*O_pad rows
                                ((c,k,o) conv-tap rows then O_pad bias rows),
                                last column is the fused bias (hits the 1-row)
    out_ref  : [O_pad, T_out, GB]  output, groups in lanes (lane-dense store)
    gen_ref  : [R, GB]          VMEM scratch for the generated weights + biases
    """
    R_W = C * K * O_PAD                      # rows holding conv-tap weights
    GB = out_ref.shape[-1]

    # Hyper-net: ONE MXU pass generates every conv-weight tap AND the output bias
    # for all GB groups of this grid step (bias = constant-1 row x bias column).
    gen_ref[...] = jnp.dot(wcat_ref[...], meta_ref[...].astype(jnp.float32),
                           preferred_element_type=jnp.float32)

    # Conv, one 128-lane slab of groups at a time.  fori_loop (not a Python for)
    # bounds the live set to one slab's accumulator (~O_pad*T_out/8 vregs).
    def slab_body(s, carry):
        lane = pl.multiple_of(s * LANE, LANE)
        bias = gen_ref[R_W:R_W + O_PAD, pl.ds(lane, LANE)]            # [O_pad,128]
        acc = jnp.broadcast_to(bias[:, None, :], (O_PAD, T_OUT, LANE))
        for c in range(C):
            xc = x_ref[c, :, pl.ds(lane, LANE)].astype(jnp.float32)   # [T_in,128]
            for k in range(K):
                row = (c * K + k) * O_PAD
                wk = gen_ref[row:row + O_PAD, pl.ds(lane, LANE)]      # [O_pad,128]
                # full 128-lane VPU FMA per cross-correlation tap; the raw x
                # window is used directly, only the weight row is broadcast.
                acc = acc + xc[k:k + T_OUT][None, :, :] * wk[:, None, :]
        out_ref[:, :, pl.ds(lane, LANE)] = acc.astype(out_ref.dtype)
        return carry

    jax.lax.fori_loop(0, GB // LANE, slab_body, 0)


def meta_conv1d(meta_knowledge, x, params, *, meta_dim, in_channels,
                out_channels, kernel_size, stride=1, padding=0, dilation=1,
                group_block=1024, io_dtype=jnp.bfloat16):
    """MetaConv1d forward. Returns [B, N, T_out, out_channels] (float32)."""
    # TODO(synk): stride/padding/dilation other than the module defaults (1,0,1)
    # are not implemented in the kernel.
    assert (stride, padding, dilation) == (1, 0, 1)

    B, N, M = meta_knowledge.shape
    _, _, T_in, C = x.shape
    assert M == meta_dim and C == in_channels
    D, O, K = meta_dim, out_channels, kernel_size
    G = B * N
    T_out = T_in - K + 1
    assert T_out >= 1
    O_pad = _round_up(O, 8)          # keep tap slices / output store tile-aligned
    M1 = M + 1                       # +1 for the constant-1 (bias) row
    R_tot = (C * K + 1) * O_pad

    # ---- fuse both hyper-net linears + all biases into ONE matrix ----------
    w1r = params["w1"].reshape(C, D, M).astype(jnp.float32)
    w2r = params["w2"].reshape(O, K, D).astype(jnp.float32)
    b1r = params["b1"].reshape(C, D).astype(jnp.float32)
    b2r = params["b2"].reshape(O, K).astype(jnp.float32)
    w_comb = jnp.einsum("cdm,okd->ckom", w1r, w2r)                  # [C,K,O,M]
    b_comb = jnp.einsum("cd,okd->cko", b1r, w2r) + b2r.T[None]      # [C,K,O]
    wb = params["wb"].astype(jnp.float32)                           # [O,M]
    bb = params["bb"].astype(jnp.float32)                           # [O]
    if O_pad != O:
        w_comb = jnp.pad(w_comb, ((0, 0), (0, 0), (0, O_pad - O), (0, 0)))
        b_comb = jnp.pad(b_comb, ((0, 0), (0, 0), (0, O_pad - O)))
        wb = jnp.pad(wb, ((0, O_pad - O), (0, 0)))
        bb = jnp.pad(bb, ((0, O_pad - O),))
    w_rows = jnp.concatenate([w_comb.reshape(C * K * O_pad, M), wb], axis=0)
    b_rows = jnp.concatenate([b_comb.reshape(C * K * O_pad), bb], axis=0)
    wcat = jnp.concatenate([w_rows, b_rows[:, None]], axis=1)       # [R_tot, M+1]

    # ---- pick GB (groups per grid step) from the chip's VMEM capacity ------
    isz = jnp.dtype(io_dtype).itemsize
    total_lanes = LANE * _cdiv(G, LANE)
    try:
        vmem_cap = pltpu.get_tpu_info().vmem_capacity_bytes
    except Exception:                # conservative fallback (v7x-sized VMEM)
        vmem_cap = 64 * 1024 * 1024
    budget = (vmem_cap * 5) // 8     # leave compiler / pipeline headroom
    bytes_fixed = 2 * _round_up(R_tot, 8) * _round_up(M1, 128) * 4       # wcat x2
    bytes_per_lane = (2 * _round_up(M1, 8) * isz                   # meta  x2
                      + 2 * C * _round_up(T_in, 8) * isz           # x     x2
                      + 2 * O_pad * _round_up(T_out, 8) * 4        # out   x2
                      + R_tot * 4)                                 # gen scratch
    max_gb = LANE * max(1, (budget - bytes_fixed) // (bytes_per_lane * LANE))
    group_block = LANE * max(1, group_block // LANE)
    GB = min(group_block, max_gb, total_lanes)
    n_slabs = total_lanes // LANE
    if GB >= total_lanes and n_slabs >= 2:
        # force >= 2 grid steps so v7x's two TensorCores both get work
        GB = LANE * ((n_slabs + 1) // 2)
    G_pad = GB * _cdiv(G, GB)
    vmem_limit = int(min(budget,
                         max(2 * (bytes_fixed + bytes_per_lane * GB),
                             32 * 1024 * 1024)))

    # ---- groups-in-lanes layouts (wrapper-side relayouts; production code
    #      should pass pre-transposed inputs to avoid these HBM passes) ------
    mk = meta_knowledge.reshape(G, M)
    xg = x.reshape(G, T_in, C)
    if G_pad != G:
        mk = jnp.pad(mk, ((0, G_pad - G), (0, 0)))
        xg = jnp.pad(xg, ((0, G_pad - G), (0, 0), (0, 0)))
    meta_lane = jnp.concatenate(
        [mk.T, jnp.ones((1, G_pad), mk.dtype)], axis=0).astype(io_dtype)  # [M+1,G_pad]
    x_lane = xg.transpose(2, 1, 0).astype(io_dtype)                       # [C,T_in,G_pad]

    kernel = functools.partial(_meta_conv_kernel, C=C, O_PAD=O_pad, K=K,
                               T_OUT=T_out)

    out_lane = pl.pallas_call(
        kernel,
        out_shape=jax.ShapeDtypeStruct((O_pad, T_out, G_pad), jnp.float32),
        grid_spec=pltpu.PrefetchScalarGridSpec(
            num_scalar_prefetch=0,
            grid=(G_pad // GB,),
            in_specs=[
                pl.BlockSpec((M1, GB), lambda g: (0, g)),            # meta (+1 row)
                pl.BlockSpec((C, T_in, GB), lambda g: (0, 0, g)),    # x
                pl.BlockSpec((R_tot, M1), lambda g: (0, 0)),         # fused W | b
            ],
            out_specs=pl.BlockSpec((O_pad, T_out, GB), lambda g: (0, 0, g)),
            scratch_shapes=[pltpu.VMEM((R_tot, GB), jnp.float32)],   # generated W
        ),
        compiler_params=pltpu.CompilerParams(
            dimension_semantics=("parallel",),
            vmem_limit_bytes=vmem_limit,
        ),
    )(meta_lane, x_lane, wcat)

    out = out_lane[:O].transpose(2, 1, 0)[:G]                        # [G,T_out,O]
    return out.reshape(B, N, T_out, O)


def reference(meta_knowledge, x, params, *, meta_dim, in_channels,
              out_channels, kernel_size):
    """Pure-JAX replica of the PyTorch forward for validation."""
    B, N, M = meta_knowledge.shape
    _, _, T_in, C = x.shape
    D, O, K = meta_dim, out_channels, kernel_size
    G = B * N
    T_out = T_in - K + 1

    mk = meta_knowledge.reshape(G, M)
    y1 = mk @ params["w1"].T + params["b1"]              # [G, C*D]
    y1 = y1.reshape(G, C, D)
    y2 = y1 @ params["w2"].T + params["b2"]              # [G, C, O*K]
    w = y2.reshape(G, C, O, K).transpose(0, 2, 1, 3)     # [G, O, C, K]
    bias = mk @ params["wb"].T + params["bb"]            # [G, O]

    xg = x.reshape(G, T_in, C)
    patches = jnp.stack([xg[:, k:k + T_out, :] for k in range(K)], axis=-1)  # [G,T_out,C,K]
    out = jnp.einsum("gtck,gock->gto", patches, w) + bias[:, None, :]
    return out.reshape(B, N, T_out, O)


if __name__ == "__main__":
    def make_case(key, B, N, M, C, O, K, T_in, scale=0.1):
        ks = jax.random.split(key, 8)
        meta = jax.random.normal(ks[0], (B, N, M), jnp.float32)
        x = jax.random.normal(ks[1], (B, N, T_in, C), jnp.float32)
        D = M
        params = {
            "w1": scale * jax.random.normal(ks[2], (C * D, M), jnp.float32),
            "b1": scale * jax.random.normal(ks[3], (C * D,), jnp.float32),
            "w2": scale * jax.random.normal(ks[4], (O * K, D), jnp.float32),
            "b2": scale * jax.random.normal(ks[5], (O * K,), jnp.float32),
            "wb": scale * jax.random.normal(ks[6], (O, M), jnp.float32),
            "bb": scale * jax.random.normal(ks[7], (O,), jnp.float32),
        }
        return meta, x, params

    key = jax.random.PRNGKey(0)
    k1, k2, _ = jax.random.split(key, 3)

    # --- case 1: module-consistent small shapes, exact f32 io ----------------
    B, N, M, C, O, K, T_in = 2, 4, 8, 4, 8, 3, 16
    meta, x, params = make_case(k1, B, N, M, C, O, K, T_in)
    out = jax.block_until_ready(
        meta_conv1d(meta, x, params, meta_dim=M, in_channels=C,
                    out_channels=O, kernel_size=K, io_dtype=jnp.float32))
    ref = reference(meta, x, params, meta_dim=M, in_channels=C,
                    out_channels=O, kernel_size=K)
    assert out.shape == (B, N, T_in - K + 1, O), out.shape
    np.testing.assert_allclose(np.asarray(out), np.asarray(ref),
                               rtol=1e-4, atol=1e-4)

    # --- case 2: same shapes, default bf16 io (compare vs bf16-rounded ref) --
    out_bf = jax.block_until_ready(
        meta_conv1d(meta, x, params, meta_dim=M, in_channels=C,
                    out_channels=O, kernel_size=K))
    meta_r = meta.astype(jnp.bfloat16).astype(jnp.float32)
    x_r = x.astype(jnp.bfloat16).astype(jnp.float32)
    ref_bf = reference(meta_r, x_r, params, meta_dim=M, in_channels=C,
                       out_channels=O, kernel_size=K)
    np.testing.assert_allclose(np.asarray(out_bf), np.asarray(ref_bf),
                               rtol=1e-3, atol=1e-3)

    # --- case 3: O not a multiple of 8, G > 128 (multi-step grid path) -------
    B, N, M, C, O, K, T_in = 5, 60, 7, 3, 5, 2, 12
    meta, x, params = make_case(k2, B, N, M, C, O, K, T_in)
    out = jax.block_until_ready(
        meta_conv1d(meta, x, params, meta_dim=M, in_channels=C,
                    out_channels=O, kernel_size=K, io_dtype=jnp.float32))
    ref = reference(meta, x, params, meta_dim=M, in_channels=C,
                    out_channels=O, kernel_size=K)
    assert out.shape == (B, N, T_in - K + 1, O), out.shape
    np.testing.assert_allclose(np.asarray(out), np.asarray(ref),
                               rtol=1e-4, atol=1e-4)

    print("KERNEL_OK")
</pallas_src>

<mosaic_0001>
module attributes {stable_mosaic.version = 11 : i64} {
  func.func @_meta_conv_kernel(%arg0: i32, %arg1: memref<9x128xf32, #tpu.memory_space<vmem>>, %arg2: memref<4x16x128xf32, #tpu.memory_space<vmem>>, %arg3: memref<104x9xf32, #tpu.memory_space<vmem>>, %arg4: memref<8x14x128xf32, #tpu.memory_space<vmem>>, %arg5: memref<104x128xf32, #tpu.memory_space<vmem>>) attributes {dimension_semantics = [#tpu.dimension_semantics<parallel>], iteration_bounds = array<i64: 1>, scalar_prefetch = 0 : i64, scratch_operands = 1 : i64, tpu.core_type = #tpu.core_type<tc>, window_params = [{transform_indices = @transform_0, window_bounds = array<i64: 9, 128>}, {transform_indices = @transform_1, window_bounds = array<i64: 4, 16, 128>}, {pipeline_mode = #tpu.pipeline_mode<synchronous>, transform_indices = @transform_2, window_bounds = array<i64: 104, 9>}, {transform_indices = @transform_3, window_bounds = array<i64: 8, 14, 128>}]} {
    %c0 = arith.constant 0 : index
    %c0_0 = arith.constant 0 : index
    %0 = vector.load %arg3[%c0, %c0_0] : memref<104x9xf32, #tpu.memory_space<vmem>>, vector<104x9xf32>
    %c0_1 = arith.constant 0 : index
    %c0_2 = arith.constant 0 : index
    %1 = vector.load %arg1[%c0_1, %c0_2] : memref<9x128xf32, #tpu.memory_space<vmem>>, vector<9x128xf32>
    %cst = arith.constant dense<0.000000e+00> : vector<104x128xf32>
    %2 = tpu.matmul %0, %1, %cst {dimension_numbers = #tpu.dot_dimension_numbers<[1], [0], [0], [1], [0, 0, 1, 1], [], []>} : vector<104x9xf32>, vector<9x128xf32>, vector<104x128xf32> -> vector<104x128xf32>
    %c0_3 = arith.constant 0 : index
    %c0_4 = arith.constant 0 : index
    %3 = vector.load %arg5[%c0_3, %c0_4] : memref<104x128xf32, #tpu.memory_space<vmem>>, vector<104x128xf32>
    tpu.vector_store %arg5[%c0_3, %c0_4], %2 {strides = array<i32>} : memref<104x128xf32, #tpu.memory_space<vmem>>, vector<104x128xf32>,
    %c0_i32 = arith.constant 0 : i32
    %c128_i32 = arith.constant 128 : i32
    %4 = arith.muli %c0_i32, %c128_i32 : i32
    %5 = tpu.assume_multiple %4, 128 : i32
    %c96 = arith.constant 96 : index
    %6 = arith.index_cast %5 : i32 to index
    %7 = vector.load %arg5[%c96, %6] : memref<104x128xf32, #tpu.memory_space<vmem>>, vector<8x128xf32>
    %8 = vector.shape_cast %7 : vector<8x128xf32> to vector<8x1x128xf32>
    %9 = vector.shape_cast %8 : vector<8x1x128xf32> to vector<8x1x128xf32>
    %10 = vector.broadcast %9 : vector<8x1x128xf32> to vector<8x14x128xf32>
    %c0_5 = arith.constant 0 : index
    %c0_6 = arith.constant 0 : index
    %11 = arith.index_cast %5 : i32 to index
    %12 = vector.load %arg2[%c0_5, %c0_6, %11] : memref<4x16x128xf32, #tpu.memory_space<vmem>>, vector<1x16x128xf32>
    %13 = vector.shape_cast %12 : vector<1x16x128xf32> to vector<16x128xf32>
    %c0_7 = arith.constant 0 : index
    %14 = arith.index_cast %5 : i32 to index
    %15 = vector.load %arg5[%c0_7, %14] : memref<104x128xf32, #tpu.memory_space<vmem>>, vector<8x128xf32>
    %16 = vector.extract_strided_slice %13 {offsets = [0, 0], sizes = [14, 128], strides = [1, 1]} : vector<16x128xf32> to vector<14x128xf32>
    %17 = vector.shape_cast %16 : vector<14x128xf32> to vector<1x14x128xf32>
    %18 = vector.shape_cast %15 : vector<8x128xf32> to vector<8x1x128xf32>
    %19 = vector.broadcast %17 : vector<1x14x128xf32> to vector<8x14x128xf32>
    %20 = vector.broadcast %18 : vector<8x1x128xf32> to vector<8x14x128xf32>
    %21 = arith.mulf %19, %20 : vector<8x14x128xf32>
    %22 = arith.addf %10, %21 : vector<8x14x128xf32>
    %c8 = arith.constant 8 : index
    %23 = arith.index_cast %5 : i32 to index
    %24 = vector.load %arg5[%c8, %23] : memref<104x128xf32, #tpu.memory_space<vmem>>, vector<8x128xf32>
    %25 = vector.extract_strided_slice %13 {offsets = [1, 0], sizes = [14, 128], strides = [1, 1]} : vector<16x128xf32> to vector<14x128xf32>
    %26 = vector.shape_cast %25 : vector<14x128xf32> to vector<1x14x128xf32>
    %27 = vector.shape_cast %24 : vector<8x128xf32> to vector<8x1x128xf32>
    %28 = vector.broadcast %26 : vector<1x14x128xf32> to vector<8x14x128xf32>
    %29 = vector.broadcast %27 : vector<8x1x128xf32> to vector<8x14x128xf32>
    %30 = arith.mulf %28, %29 : vector<8x14x128xf32>
    %31 = arith.addf %22, %30 : vector<8x14x128xf32>
    %c16 = arith.constant 16 : index
    %32 = arith.index_cast %5 : i32 to index
    %33 = vector.load %arg5[%c16, %32] : memref<104x128xf32, #tpu.memory_space<vmem>>, vector<8x128xf32>
    %34 = vector.extract_strided_slice %13 {offsets = [2, 0], sizes = [14, 128], strides = [1, 1]} : vector<16x128xf32> to vector<14x128xf32>
    %35 = vector.shape_cast %34 : vector<14x128xf32> to vector<1x14x128xf32>
    %36 = vector.shape_cast %33 : vector<8x128xf32> to vector<8x1x128xf32>
    %37 = vector.broadcast %35 : vector<1x14x128xf32> to vector<8x14x128xf32>
    %38 = vector.broadcast %36 : vector<8x1x128xf32> to vector<8x14x128xf32>
    %39 = arith.mulf %37, %38 : vector<8x14x128xf32>
    %40 = arith.addf %31, %39 : vector<8x14x128xf32>
    %c1 = arith.constant 1 : index
    %c0_8 = arith.constant 0 : index
    %41 = arith.index_cast %5 : i32 to index
    %42 = vector.load %arg2[%c1, %c0_8, %41] : memref<4x16x128xf32, #tpu.memory_space<vmem>>, vector<1x16x128xf32>
    %43 = vector.shape_cast %42 : vector<1x16x128xf32> to vector<16x128xf32>
    %c24 = arith.constant 24 : index
    %44 = arith.index_cast %5 : i32 to index
    %45 = vector.load %arg5[%c24, %44] : memref<104x128xf32, #tpu.memory_space<vmem>>, vector<8x128xf32>
    %46 = vector.extract_strided_slice %43 {offsets = [0, 0], sizes = [14, 128], strides = [1, 1]} : vector<16x128xf32> to vector<14x128xf32>
    %47 = vector.shape_cast %46 : vector<14x128xf32> to vector<1x14x128xf32>
    %48 = vector.shape_cast %45 : vector<8x128xf32> to vector<8x1x128xf32>
    %49 = vector.broadcast %47 : vector<1x14x128xf32> to vector<8x14x128xf32>
    %50 = vector.broadcast %48 : vector<8x1x128xf32> to vector<8x14x128xf32>
    %51 = arith.mulf %49, %50 : vector<8x14x128xf32>
    %52 = arith.addf %40, %51 : vector<8x14x128xf32>
    %c32 = arith.constant 32 : index
    %53 = arith.index_cast %5 : i32 to index
    %54 = vector.load %arg5[%c32, %53] : memref<104x128xf32, #tpu.memory_space<vmem>>, vector<8x128xf32>
    %55 = vector.extract_strided_slice %43 {offsets = [1, 0], sizes = [14, 128], strides = [1, 1]} : vector<16x128xf32> to vector<14x128xf32>
    %56 = vector.shape_cast %55 : vector<14x128xf32> to vector<1x14x128xf32>
    %57 = vector.shape_cast %54 : vector<8x128xf32> to vector<8x1x128xf32>
    %58 = vector.broadcast %56 : vector<1x14x128xf32> to vector<8x14x128xf32>
    %59 = vector.broadcast %57 : vector<8x1x128xf32> to vector<8x14x128xf32>
    %60 = arith.mulf %58, %59 : vector<8x14x128xf32>
    %61 = arith.addf %52, %60 : vector<8x14x128xf32>
    %c40 = arith.constant 40 : index
    %62 = arith.index_cast %5 : i32 to index
    %63 = vector.load %arg5[%c40, %62] : memref<104x128xf32, #tpu.memory_space<vmem>>, vector<8x128xf32>
    %64 = vector.extract_strided_slice %43 {offsets = [2, 0], sizes = [14, 128], strides = [1, 1]} : vector<16x128xf32> to vector<14x128xf32>
    %65 = vector.shape_cast %64 : vector<14x128xf32> to vector<1x14x128xf32>
    %66 = vector.shape_cast %63 : vector<8x128xf32> to vector<8x1x128xf32>
    %67 = vector.broadcast %65 : vector<1x14x128xf32> to vector<8x14x128xf32>
    %68 = vector.broadcast %66 : vector<8x1x128xf32> to vector<8x14x128xf32>
    %69 = arith.mulf %67, %68 : vector<8x14x128xf32>
    %70 = arith.addf %61, %69 : vector<8x14x128xf32>
    %c2 = arith.constant 2 : index
    %c0_9 = arith.constant 0 : index
    %71 = arith.index_cast %5 : i32 to index
    %72 = vector.load %arg2[%c2, %c0_9, %71] : memref<4x16x128xf32, #tpu.memory_space<vmem>>, vector<1x16x128xf32>
    %73 = vector.shape_cast %72 : vector<1x16x128xf32> to vector<16x128xf32>
    %c48 = arith.constant 48 : index
    %74 = arith.index_cast %5 : i32 to index
    %75 = vector.load %arg5[%c48, %74] : memref<104x128xf32, #tpu.memory_space<vmem>>, vector<8x128xf32>
    %76 = vector.extract_strided_slice %73 {offsets = [0, 0], sizes = [14, 128], strides = [1, 1]} : vector<16x128xf32> to vector<14x128xf32>
    %77 = vector.shape_cast %76 : vector<14x128xf32> to vector<1x14x128xf32>
    %78 = vector.shape_cast %75 : vector<8x128xf32> to vector<8x1x128xf32>
    %79 = vector.broadcast %77 : vector<1x14x128xf32> to vector<8x14x128xf32>
    %80 = vector.broadcast %78 : vector<8x1x128xf32> to vector<8x14x128xf32>
    %81 = arith.mulf %79, %80 : vector<8x14x128xf32>
    %82 = arith.addf %70, %81 : vector<8x14x128xf32>
    %c56 = arith.constant 56 : index
    %83 = arith.index_cast %5 : i32 to index
    %84 = vector.load %arg5[%c56, %83] : memref<104x128xf32, #tpu.memory_space<vmem>>, vector<8x128xf32>
    %85 = vector.extract_strided_slice %73 {offsets = [1, 0], sizes = [14, 128], strides = [1, 1]} : vector<16x128xf32> to vector<14x128xf32>
    %86 = vector.shape_cast %85 : vector<14x128xf32> to vector<1x14x128xf32>
    %87 = vector.shape_cast %84 : vector<8x128xf32> to vector<8x1x128xf32>
    %88 = vector.broadcast %86 : vector<1x14x128xf32> to vector<8x14x128xf32>
    %89 = vector.broadcast %87 : vector<8x1x128xf32> to vector<8x14x128xf32>
    %90 = arith.mulf %88, %89 : vector<8x14x128xf32>
    %91 = arith.addf %82, %90 : vector<8x14x128xf32>
    %c64 = arith.constant 64 : index
    %92 = arith.index_cast %5 : i32 to index
    %93 = vector.load %arg5[%c64, %92] : memref<104x128xf32, #tpu.memory_space<vmem>>, vector<8x128xf32>
    %94 = vector.extract_strided_slice %73 {offsets = [2, 0], sizes = [14, 128], strides = [1, 1]} : vector<16x128xf32> to vector<14x128xf32>
    %95 = vector.shape_cast %94 : vector<14x128xf32> to vector<1x14x128xf32>
    %96 = vector.shape_cast %93 : vector<8x128xf32> to vector<8x1x128xf32>
    %97 = vector.broadcast %95 : vector<1x14x128xf32> to vector<8x14x128xf32>
    %98 = vector.broadcast %96 : vector<8x1x128xf32> to vector<8x14x128xf32>
    %99 = arith.mulf %97, %98 : vector<8x14x128xf32>
    %100 = arith.addf %91, %99 : vector<8x14x128xf32>
    %c3 = arith.constant 3 : index
    %c0_10 = arith.constant 0 : index
    %101 = arith.index_cast %5 : i32 to index
    %102 = vector.load %arg2[%c3, %c0_10, %101] : memref<4x16x128xf32, #tpu.memory_space<vmem>>, vector<1x16x128xf32>
    %103 = vector.shape_cast %102 : vector<1x16x128xf32> to vector<16x128xf32>
    %c72 = arith.constant 72 : index
    %104 = arith.index_cast %5 : i32 to index
    %105 = vector.load %arg5[%c72, %104] : memref<104x128xf32, #tpu.memory_space<vmem>>, vector<8x128xf32>
    %106 = vector.extract_strided_slice %103 {offsets = [0, 0], sizes = [14, 128], strides = [1, 1]} : vector<16x128xf32> to vector<14x128xf32>
    %107 = vector.shape_cast %106 : vector<14x128xf32> to vector<1x14x128xf32>
    %108 = vector.shape_cast %105 : vector<8x128xf32> to vector<8x1x128xf32>
    %109 = vector.broadcast %107 : vector<1x14x128xf32> to vector<8x14x128xf32>
    %110 = vector.broadcast %108 : vector<8x1x128xf32> to vector<8x14x128xf32>
    %111 = arith.mulf %109, %110 : vector<8x14x128xf32>
    %112 = arith.addf %100, %111 : vector<8x14x128xf32>
    %c80 = arith.constant 80 : index
    %113 = arith.index_cast %5 : i32 to index
    %114 = vector.load %arg5[%c80, %113] : memref<104x128xf32, #tpu.memory_space<vmem>>, vector<8x128xf32>
    %115 = vector.extract_strided_slice %103 {offsets = [1, 0], sizes = [14, 128], strides = [1, 1]} : vector<16x128xf32> to vector<14x128xf32>
    %116 = vector.shape_cast %115 : vector<14x128xf32> to vector<1x14x128xf32>
    %117 = vector.shape_cast %114 : vector<8x128xf32> to vector<8x1x128xf32>
    %118 = vector.broadcast %116 : vector<1x14x128xf32> to vector<8x14x128xf32>
    %119 = vector.broadcast %117 : vector<8x1x128xf32> to vector<8x14x128xf32>
    %120 = arith.mulf %118, %119 : vector<8x14x128xf32>
    %121 = arith.addf %112, %120 : vector<8x14x128xf32>
    %c88 = arith.constant 88 : index
    %122 = arith.index_cast %5 : i32 to index
    %123 = vector.load %arg5[%c88, %122] : memref<104x128xf32, #tpu.memory_space<vmem>>, vector<8x128xf32>
    %124 = vector.extract_strided_slice %103 {offsets = [2, 0], sizes = [14, 128], strides = [1, 1]} : vector<16x128xf32> to vector<14x128xf32>
    %125 = vector.shape_cast %124 : vector<14x128xf32> to vector<1x14x128xf32>
    %126 = vector.shape_cast %123 : vector<8x128xf32> to vector<8x1x128xf32>
    %127 = vector.broadcast %125 : vector<1x14x128xf32> to vector<8x14x128xf32>
    %128 = vector.broadcast %126 : vector<8x1x128xf32> to vector<8x14x128xf32>
    %129 = arith.mulf %127, %128 : vector<8x14x128xf32>
    %130 = arith.addf %121, %129 : vector<8x14x128xf32>
    %c0_11 = arith.constant 0 : index
    %c0_12 = arith.constant 0 : index
    %131 = arith.index_cast %5 : i32 to index
    %132 = vector.load %arg4[%c0_11, %c0_12, %131] : memref<8x14x128xf32, #tpu.memory_space<vmem>>, vector<8x14x128xf32>
    tpu.vector_store %arg4[%c0_11, %c0_12, %131], %130 {strides = array<i32>} : memref<8x14x128xf32, #tpu.memory_space<vmem>>, vector<8x14x128xf32>,
    %c1_i32 = arith.constant 1 : i32
    return
  }
  func.func @transform_0(%arg0: i32) -> (i32, i32) {
    %c0_i32 = arith.constant 0 : i32
    %c0_i32_0 = arith.constant 0 : i32
    return %c0_i32, %arg0 : i32, i32
  }
  func.func @transform_1(%arg0: i32) -> (i32, i32, i32) {
    %c0_i32 = arith.constant 0 : i32
    %c0_i32_0 = arith.constant 0 : i32
    %c0_i32_1 = arith.constant 0 : i32
    return %c0_i32, %c0_i32_0, %arg0 : i32, i32, i32
  }
  func.func @transform_2(%arg0: i32) -> (i32, i32) {
    %c0_i32 = arith.constant 0 : i32
    %c0_i32_0 = arith.constant 0 : i32
    %c0_i32_1 = arith.constant 0 : i32
    return %c0_i32, %c0_i32_0 : i32, i32
  }
  func.func @transform_3(%arg0: i32) -> (i32, i32, i32) {
    %c0_i32 = arith.constant 0 : i32
    %c0_i32_0 = arith.constant 0 : i32
    %c0_i32_1 = arith.constant 0 : i32
    return %c0_i32, %c0_i32_0, %arg0 : i32, i32, i32
  }
}

</mosaic_0001>

<bundles_post_ra>
// kernel: tpu_custom_call.1
= control target key start
LH: loop header
LB: loop body
LE: loop exit
PB: predicated region body
PF: predicated region fallthrough
CT: control target
= control target key end

     0   :  { %vm69_vm0 = vcmask 1040384   ;;  %v2357_v0 = vmov 0.0   ;;  %vm2358_vm1 = vmmov 0   ;;  %vm29_vm2 = vcmask 72704   ;;  %s3914_s0 = inlined_call_operand.vmem [shape: f32[9,128], index: 0, kind: input, shape index: {}]   ;;  %s3915_s2 = inlined_call_operand.vmem [shape: f32[104,9], index: 2, kind: input, shape index: {}]   ;;  %s3916_s1 = inlined_call_operand.vmem [shape: f32[4,16,128], index: 1, kind: input, shape index: {}]   ;;  %s3917_s3 = inlined_call_operand.vmem [shape: f32[8,14,128], index: 3, kind: output, shape index: {}]  }
   0x1   :  { %2348 = vmatprep.subr.mxu1 %v2357_v0  ;;  %v28_v1 = vld [vmem:[%s3914_s0 + $0x8] sm:$0x1]  ;;  %2305 = vmatprep.subr.mxu0 %v2357_v0  ;;  %v27_v2 = vld [vmem:[%s3914_s0] sm:$0xff]  ;;  %v21_v3 = vld [vmem:[%s3915_s2 + $0x38] sm:$0xff]  ;;  %v2359_v16 = vmov 1966171168   ;;  %v222_v18 = vlaneseq }
   0x2   :  { %2350 = vmatpush3.msk.msra.mxu1 %vm69_vm0, %v28_v1  ;;  %2330 = vmatprep.mubr.msk.f32.mxu1 %vm2358_vm1, %v2357_v0  ;;  %v14_v4 = vld [vmem:[%s3915_s2] sm:$0xff]  ;;  %v15_v6 = vld [vmem:[%s3915_s2 + $0x8] sm:$0xff]  ;;  %v16_v8 = vld [vmem:[%s3915_s2 + $0x10] sm:$0xff]  ;;  %v220_v17 = vunpack.c.l.s4 %v2359_v16  ;;  %vm735_vm3 = vcmask 1045504   ;;  %vm555_vm4 = vcmask 1046528  }
   0x3   :  { %2349 = vmatprep.subr.mxu1 %v2357_v0  ;;  %2306 = vmatpush3.msk.msra.mxu0 %vm69_vm0, %v28_v1  ;;  %v22_v5 = vld [vmem:[%s3915_s2 + $0x40] sm:$0xff]  ;;  %v23_v7 = vld [vmem:[%s3915_s2 + $0x48] sm:$0xff]  ;;  %v24_v9 = vld [vmem:[%s3915_s2 + $0x50] sm:$0xff]  ;;  %v223_v20 = vshrl.u32 %v222_v18, 7 }
   0x4   :  { %2351 = vmatpush3.msra.mxu1 %v27_v2  ;;  %2307 = vmatprep.subr.mxu0 %v2357_v0  ;;  %v17_v10 = vld [vmem:[%s3915_s2 + $0x18] sm:$0xff]  ;;  %v18_v12 = vld [vmem:[%s3915_s2 + $0x20] sm:$0xff]  ;;  %v19_v14 = vld [vmem:[%s3915_s2 + $0x28] sm:$0xff]  ;;  %v221_v19 = vunpack.c.0.s8 %v220_v17 }
   0x5   :  { %2331 = vmatmul.mubr.msk.f32.vlgmr.msra.gmra.mxu1 %vm29_vm2, %v21_v3  ;;  %2308 = vmatpush3.msra.mxu0 %v27_v2  ;;  %v25_v11 = vld [vmem:[%s3915_s2 + $0x58] sm:$0xff]  ;;  %v26_v13 = vld [vmem:[%s3915_s2 + $0x60] sm:$0xff]  ;;  %v20_v15 = vld [vmem:[%s3915_s2 + $0x30] sm:$0xff]  ;;  %v2454_v25 = vsub.s32 0, %v223_v20 }
   0x6   :  { %2309 = vmatprep.mubr.msk.f32.mxu0 %vm2358_vm1, %v2357_v0  ;;  %2333 = vmatprep.mubr.msk.f32.mxu1 %vm2358_vm1, %v2357_v0  ;;  %v2451_v21 = vsub.s32 %v221_v19, %v223_v20  ;;  %v2466_v35 = vld [vmem:[%s3916_s1 + $0x20] sm:$0xff]  ;;  %v2471_v36 = vld [vmem:[%s3916_s1 + $0x28] sm:$0xff] }
   0x7   :  { %2310 = vmatmul.mubr.msk.f32.vlgmr.msra.gmra.mxu0 %vm29_vm2, %v14_v4  ;;  %4037 = vst [vmem:[#allocation3_spill] sm:$0xff] %v2454_v25 }
   0x8   :  { %2312 = vmatprep.mubr.msk.f32.mxu0 %vm2358_vm1, %v2357_v0 }
   0x9   :  { %2334 = vmatmul.mubr.msk.f32.gmra.mxu1 %vm29_vm2, %v22_v5 }
   0xa   :  { %2336 = vmatprep.mubr.msk.f32.mxu1 %vm2358_vm1, %v2357_v0 }
   0xb   :  { %2313 = vmatmul.mubr.msk.f32.gmra.mxu0 %vm29_vm2, %v15_v6 }
   0xc   :  { %2315 = vmatprep.mubr.msk.f32.mxu0 %vm2358_vm1, %v2357_v0 }
   0xd   :  { %2337 = vmatmul.mubr.msk.f32.gmra.mxu1 %vm29_vm2, %v23_v7 }
   0xe   :  { %2339 = vmatprep.mubr.msk.f32.mxu1 %vm2358_vm1, %v2357_v0 }
   0xf   :  { %2316 = vmatmul.mubr.msk.f32.gmra.mxu0 %vm29_vm2, %v16_v8 }
  0x10   :  { %2318 = vmatprep.mubr.msk.f32.mxu0 %vm2358_vm1, %v2357_v0 }
  0x11   :  { %2340 = vmatmul.mubr.msk.f32.gmra.mxu1 %vm29_vm2, %v24_v9 }
  0x12   :  { %2342 = vmatprep.mubr.msk.f32.mxu1 %vm2358_vm1, %v2357_v0 }
  0x13   :  { %2319 = vmatmul.mubr.msk.f32.gmra.mxu0 %vm29_vm2, %v17_v10 }
  0x14   :  { %2321 = vmatprep.mubr.msk.f32.mxu0 %vm2358_vm1, %v2357_v0 }
  0x15   :  { %2343 = vmatmul.mubr.msk.f32.gmra.mxu1 %vm29_vm2, %v25_v11 }
  0x16   :  { %2345 = vmatprep.mubr.msk.f32.mxu1 %vm2358_vm1, %v2357_v0 }
  0x17   :  { %2322 = vmatmul.mubr.msk.f32.gmra.mxu0 %vm29_vm2, %v18_v12 }
  0x18   :  { %2324 = vmatprep.mubr.msk.f32.mxu0 %vm2358_vm1, %v2357_v0 }
  0x19   :  { %2346 = vmatmul.mubr.msk.f32.gmra.mxu1 %vm29_vm2, %v26_v13 }
  0x1b   :  { %2325 = vmatmul.mubr.msk.f32.gmra.mxu0 %vm29_vm2, %v19_v14 }
  0x1c   :  { %2327 = vmatprep.mubr.msk.f32.mxu0 %vm2358_vm1, %v2357_v0 }
  0x1f   :  { %2328 = vmatmul.mubr.msk.f32.gmra.mxu0 %vm29_vm2, %v20_v15 }
  0xc5   :  { %v174_v22 = vpop.f32.mrf.mxu1 }
  0xc6   :  { %v1406_v23 = vcombine.high %v174_v22, %v174_v22  ;;  %v1413_v24 = vrot.slane %v174_v22, %v2451_v21 }
  0xc7   :  { %v2332_v26 = vpop.f32.mrf.mxu1  ;;  %v139_v27 = vpop.f32.mrf.mxu0 }
  0xc8   :  { %v1420_v28 = vrot.slane %v1406_v23, %v2451_v21  ;;  %v1421_v29 = vcombine.high %v1413_v24, %v1413_v24  ;;  %v1429_v30 = vrot.slane %v1413_v24, %v2451_v21  ;;  %v311_v31 = vcombine.high %v139_v27, %v139_v27 }
  0xc9   :  { %v2459_v32 = vrot.slane %v139_v27, %v2451_v21  ;;  %v2461_v33 = vpop.f32.mrf.mxu1  ;;  %v2311_v34 = vpop.f32.mrf.mxu0 }
  0xca   :  { %v1422_v37 = vcombine.high %v1420_v28, %v1420_v28  ;;  %v1436_v38 = vrot.slane %v1420_v28, %v2451_v21  ;;  %v1443_v39 = vrot.slane %v1421_v29, %v2451_v21  ;;  %v1451_v40 = vcombine.high %v1429_v30, %v1429_v30 }
  0xcb   :  { %v1458_v41 = vrot.slane %v1429_v30, %v2454_v25  ;;  %v2477_v42 = vrot.slane %v311_v31, %v2451_v21  ;;  %v326_v43 = vcombine.high %v2459_v32, %v2459_v32  ;;  %v2483_v44 = vrot.slane %v2459_v32, %v2451_v21  ;;  %v2335_v45 = vpop.f32.mrf.mxu1  ;;  %v2485_v46 = vpop.f32.mrf.mxu0 }
  0xcc   :  { %v1450_v47 = vrot.slane %v1422_v37, %v2451_v21  ;;  %v1452_v48 = vcombine.high %v1436_v38, %v1436_v38  ;;  %v1453_v49 = vcombine.high %v1443_v39, %v1443_v39  ;;  %v1462_v50 = vrot.slane %v1443_v39, %v2454_v25  ;;  %v2574_v45 = vld [vmem:[%s3916_s1] sm:$0xff] }
  0xcd   :  { %v1466_v51 = vrot.slane %v1451_v40, %v2454_v25  ;;  %v1474_v52 = vrot.slane %v1436_v38, %v2454_v25  ;;  %v2492_v53 = vmul.f32 %v2466_v35, %v1458_v41  ;;  %v2495_v54 = vmul.f32 %v2471_v36, %v1458_v41  ;;  %v2497_v55 = vpop.f32.mrf.mxu1  ;;  %v2314_v56 = vpop.f32.mrf.mxu0 }
  0xce   :  { %v1454_v57 = vcombine.high %v1450_v47, %v1450_v47  ;;  %v1470_v58 = vrot.slane %v1453_v49, %v2454_v25  ;;  %v1478_v59 = vrot.slane %v1450_v47, %v2454_v25  ;;  %v1482_v60 = vrot.slane %v1452_v48, %v2454_v25  ;;  %v2588_v56 = vld [vmem:[%s3916_s1 + $0x8] sm:$0xff] }
  0xcf   :  { %4038 = vst [vmem:[#allocation4_spill] sm:$0xff] %v2492_v53  ;;  %4039 = vst [vmem:[#allocation5_spill] sm:$0xff] %v2495_v54  ;;  %v2503_v61 = vmul.f32 %v2466_v35, %v1462_v50  ;;  %v2506_v62 = vmul.f32 %v2471_v36, %v1462_v50  ;;  %v2509_v63 = vmul.f32 %v2466_v35, %v1466_v51  ;;  %v2338_v1 = vpop.f32.mrf.mxu1  ;;  %v2514_v2 = vpop.f32.mrf.mxu0 }
  0xd0   :  { %v2512_v0 = vmul.f32 %v2471_v36, %v1466_v51  ;;  %v1486_v3 = vrot.slane %v1454_v57, %v2454_v25  ;;  %v2518_v4 = vmul.f32 %v2466_v35, %v1470_v58  ;;  %v2521_v5 = vmul.f32 %v2471_v36, %v1470_v58 }
  0xd1   :  { %4040 = vst [vmem:[#allocation6_spill] sm:$0xff] %v2503_v61  ;;  %4041 = vst [vmem:[#allocation7_spill] sm:$0xff] %v2506_v62  ;;  %v2524_v6 = vmul.f32 %v2466_v35, %v1474_v52  ;;  %v2527_v7 = vmul.f32 %v2471_v36, %v1474_v52  ;;  %v2530_v8 = vmul.f32 %v2466_v35, %v1478_v59  ;;  %v2538_v11 = vpop.f32.mrf.mxu1  ;;  %v2317_v12 = vpop.f32.mrf.mxu0 }
  0xd2   :  { %4042 = vst [vmem:[#allocation8_spill] sm:$0xff] %v2509_v63  ;;  %4043 = vst [vmem:[#allocation9_spill] sm:$0xff] %v2512_v0  ;;  %v2533_v9 = vmul.f32 %v2471_v36, %v1478_v59  ;;  %v2536_v10 = vmul.f32 %v2466_v35, %v1482_v60  ;;  %v2541_v13 = vmul.f32 %v2471_v36, %v1482_v60 }
  0xd3   :  { %4044 = vst [vmem:[#allocation10_spill] sm:$0xff] %v2518_v4  ;;  %4045 = vst [vmem:[#allocation11_spill] sm:$0xff] %v2521_v5  ;;  %v2544_v14 = vmul.f32 %v2466_v35, %v1486_v3  ;;  %v2547_v15 = vmul.f32 %v2471_v36, %v1486_v3  ;;  %v2341_v22 = vpop.f32.mrf.mxu1  ;;  %v2554_v23 = vpop.f32.mrf.mxu0  ;;  %v327_v41 = vcombine.high %v2477_v42, %v2477_v42 }
  0xd4   :  { %4046 = vst [vmem:[#allocation12_spill] sm:$0xff] %v2524_v6  ;;  %4047 = vst [vmem:[#allocation13_spill] sm:$0xff] %v2527_v7  ;;  %v341_v47 = vrot.slane %v2477_v42, %v2451_v21  ;;  %v348_v48 = vrot.slane %v326_v43, %v2451_v21  ;;  %v356_v49 = vcombine.high %v2483_v44, %v2483_v44 }
  0xd5   :  { %4048 = vst [vmem:[#allocation14_spill] sm:$0xff] %v2530_v8  ;;  %4049 = vst [vmem:[#allocation15_spill] sm:$0xff] %v2533_v9  ;;  %v2564_v34 = vpop.f32.mrf.mxu1  ;;  %v2320_v37 = vpop.f32.mrf.mxu0  ;;  %v363_v50 = vrot.slane %v2483_v44, %v2454_v25  ;;  %v355_v57 = vrot.slane %v327_v41, %v2451_v21  ;;  %v1585_v42 = vcombine.high %v2461_v33, %v2461_v33 }
  0xd6   :  { %4050 = vst [vmem:[#allocation16_spill] sm:$0xff] %v2536_v10  ;;  %4051 = vst [vmem:[#allocation17_spill] sm:$0xff] %v2541_v13  ;;  %v1592_v43 = vrot.slane %v2461_v33, %v2451_v21  ;;  %v434_v58 = vcombine.high %v2485_v46, %v2485_v46  ;;  %v357_v44 = vcombine.high %v341_v47, %v341_v47 }
  0xd7   :  { %4052 = vst [vmem:[#allocation18_spill] sm:$0xff] %v2544_v14  ;;  %4053 = vst [vmem:[#allocation19_spill] sm:$0xff] %v2547_v15  ;;  %v2344_v51 = vpop.f32.mrf.mxu1  ;;  %v2583_v52 = vpop.f32.mrf.mxu0  ;;  %v358_v59 = vcombine.high %v348_v48, %v348_v48  ;;  %v367_v60 = vrot.slane %v348_v48, %v2454_v25  ;;  %v371_v1 = vrot.slane %v356_v49, %v2454_v25 }
  0xd8   :  { %v359_v22 = vcombine.high %v355_v57, %v355_v57  ;;  %v379_v37 = vrot.slane %v341_v47, %v2454_v25  ;;  %v383_v41 = vrot.slane %v355_v57, %v2454_v25  ;;  %v2604_v51 = vmul.f32 %v363_v50, %v2574_v45 }
  0xd9   :  { %v2599_v3 = vpop.f32.mrf.mxu1  ;;  %v2323_v12 = vpop.f32.mrf.mxu0  ;;  %v375_v33 = vrot.slane %v358_v59, %v2454_v25  ;;  %v387_v39 = vrot.slane %v357_v44, %v2454_v25  ;;  %v2609_v40 = vmul.f32 %v363_v50, %v2588_v56  ;;  %v2612_v48 = vmul.f32 %v367_v60, %v2574_v45 }
  0xda   :  { %v391_v47 = vrot.slane %v359_v22, %v2454_v25  ;;  %v2618_v57 = vmul.f32 %v367_v60, %v2588_v56  ;;  %v2621_v32 = vmul.f32 %v371_v1, %v2574_v45  ;;  %v2624_v59 = vmul.f32 %v371_v1, %v2588_v56 }
  0xdb   :  { %v2347_v49 = vpop.f32.mrf.mxu1  ;;  %v2614_v12 = vpop.f32.mrf.mxu0  ;;  %v2627_v50 = vmul.f32 %v375_v33, %v2574_v45  ;;  %v2630_v44 = vmul.f32 %v375_v33, %v2588_v56  ;;  %v2636_v22 = vmul.f32 %v379_v37, %v2588_v56  ;;  %v2639_v38 = vmul.f32 %v383_v41, %v2574_v45 }
  0xdc   :  { %4054 = vst [vmem:[#allocation20_spill] sm:$0xff] %v2614_v12  ;;  %v2633_v49 = vmul.f32 %v379_v37, %v2574_v45  ;;  %v2642_v30 = vmul.f32 %v383_v41, %v2588_v56  ;;  %v2645_v1 = vmul.f32 %v387_v39, %v2574_v45  ;;  %v2648_v31 = vmul.f32 %v387_v39, %v2588_v56 }
  0xdd   :  { %v2326_v60 = vpop.f32.mrf.mxu0  ;;  %v2651_v33 = vmul.f32 %v391_v47, %v2574_v45  ;;  %v2654_v28 = vmul.f32 %v391_v47, %v2588_v56  ;;  %v1599_v37 = vrot.slane %v1585_v42, %v2451_v21  ;;  %v1608_v29 = vrot.slane %v1592_v43, %v2451_v21 }
  0xde   :  { %v1600_v60 = vcombine.high %v1592_v43, %v1592_v43  ;;  %v2660_v41 = vrot.slane %v2485_v46, %v2451_v21  ;;  %v2663_v26 = vrot.slane %v434_v58, %v2451_v21  ;;  %v2671_v42 = vrot.slane %v2497_v55, %v2451_v21 }
  0xdf   :  { %v1601_v27 = vcombine.high %v1599_v37, %v1599_v37  ;;  %v1615_v47 = vrot.slane %v1599_v37, %v2451_v21  ;;  %v1630_v43 = vcombine.high %v1608_v29, %v1608_v29  ;;  %v1637_v46 = vrot.slane %v1608_v29, %v2454_v25 }
  0xe0   :  { %v1622_v20 = vrot.slane %v1600_v60, %v2451_v21  ;;  %v449_v58 = vcombine.high %v2660_v41, %v2660_v41  ;;  %v450_v24 = vcombine.high %v2663_v26, %v2663_v26 }
  0xe1   :  { %v1629_v18 = vrot.slane %v1601_v27, %v2451_v21  ;;  %v1631_v19 = vcombine.high %v1615_v47, %v1615_v47  ;;  %v1645_v60 = vrot.slane %v1630_v43, %v2454_v25  ;;  %v1653_v17 = vrot.slane %v1615_v47, %v2454_v25 }
  0xe2   :  { %v1632_v16 = vcombine.high %v1622_v20, %v1622_v20  ;;  %v1641_v37 = vrot.slane %v1622_v20, %v2454_v25  ;;  %v1674_v39 = vmul.f32 %v2466_v35, %v1637_v46  ;;  %v2684_v29 = vmul.f32 %v2471_v36, %v1637_v46 }
  0xe3   :  { %v1633_v14 = vcombine.high %v1629_v18, %v1629_v18  ;;  %v1657_v10 = vrot.slane %v1629_v18, %v2454_v25  ;;  %v1661_v27 = vrot.slane %v1631_v19, %v2454_v25  ;;  %v1678_v43 = vmul.f32 %v2466_v35, %v1645_v60 }
  0xe4   :  { %4055 = vst [vmem:[#allocation21_spill] sm:$0xff] %v2684_v29  ;;  %v1649_v15 = vrot.slane %v1632_v16, %v2454_v25  ;;  %v1676_v13 = vmul.f32 %v2466_v35, %v1641_v37  ;;  %v2691_v20 = vmul.f32 %v2471_v36, %v1641_v37  ;;  %v2695_v47 = vmul.f32 %v2471_v36, %v1645_v60 }
  0xe5   :  { %v1665_v46 = vrot.slane %v1633_v14, %v2454_v25  ;;  %v1682_v18 = vmul.f32 %v2466_v35, %v1653_v17  ;;  %v2704_v19 = vmul.f32 %v2471_v36, %v1653_v17  ;;  %v1684_v37 = vmul.f32 %v2466_v35, %v1657_v10 }
  0xe6   :  { %4056 = vst [vmem:[#allocation22_spill] sm:$0xff] %v2691_v20  ;;  %4057 = vst [vmem:[#allocation23_spill] sm:$0xff] %v2695_v47  ;;  %v1680_v8 = vmul.f32 %v2466_v35, %v1649_v15  ;;  %v2700_v16 = vmul.f32 %v2471_v36, %v1649_v15  ;;  %v2708_v9 = vmul.f32 %v2471_v36, %v1657_v10  ;;  %v1706_v7 = vrot.slane %v1674_v39, 2 }
  0xe7   :  { %4059 = vst [vmem:[#allocation25_spill] sm:$0xff] %v2704_v19  ;;  %v1686_v60 = vmul.f32 %v2466_v35, %v1661_v27  ;;  %v2712_v6 = vmul.f32 %v2471_v36, %v1661_v27  ;;  %v1688_v14 = vmul.f32 %v2466_v35, %v1665_v46  ;;  %v2716_v15 = vmul.f32 %v2471_v36, %v1665_v46  ;;  %v2722_v27 = vpop.f32.mrf.mxu0 }
  0xe8   :  { %4058 = vst [vmem:[#allocation24_spill] sm:$0xff] %v2700_v16  ;;  %4060 = vst [vmem:[#allocation26_spill] sm:$0xff] %v2708_v9  ;;  %v3944_v4 = vrot.slane %v2684_v29, 2  ;;  %v1709_v17 = vrot.slane %v1676_v13, 2  ;;  %v3939_v5 = vrot.slane %v2691_v20, 2  ;;  %v1712_v63 = vrot.slane %v1678_v43, 2 }
  0xe9   :  { %4061 = vst [vmem:[#allocation27_spill] sm:$0xff] %v2712_v6  ;;  %4062 = vst [vmem:[#allocation28_spill] sm:$0xff] %v2716_v15  ;;  %v3940_v10 = vrot.slane %v2695_v47, 2  ;;  %v1715_v0 = vrot.slane %v1680_v8, 2  ;;  %v3943_v61 = vrot.slane %v2700_v16, 2  ;;  %v1718_v62 = vrot.slane %v1682_v18, 2  ;;  %v2329_v18 = vpop.f32.mrf.mxu0 }
  0xea   :  { %4063 = vst [vmem:[#allocation29_spill] sm:$0xff] %v2722_v27  ;;  %v2727_v35 = vsel %vm735_vm3, %v1706_v7, %v3944_v4  ;;  %v2732_v36 = vsel %vm735_vm3, %v1709_v17, %v3939_v5  ;;  %v3942_v13 = vrot.slane %v2704_v19, 2  ;;  %v1721_v39 = vrot.slane %v1684_v37, 2 }
  0xeb   :  { %4064 = vst [vmem:[#allocation30_spill] sm:$0xff] %v2727_v35  ;;  %4065 = vst [vmem:[#allocation31_spill] sm:$0xff] %v2732_v36  ;;  %v2738_v8 = vsel %vm735_vm3, %v1712_v63, %v3940_v10  ;;  %v2743_v43 = vsel %vm735_vm3, %v1715_v0, %v3943_v61  ;;  %v3941_v7 = vrot.slane %v2708_v9, 2  ;;  %v1724_v46 = vrot.slane %v1686_v60, 2 }
  0xec   :  { %4066 = vst [vmem:[#allocation32_spill] sm:$0xff] %v2738_v8  ;;  %4067 = vst [vmem:[#allocation33_spill] sm:$0xff] %v2743_v43  ;;  %v2749_v17 = vsel %vm735_vm3, %v1718_v62, %v3942_v13  ;;  %v3945_v37 = vrot.slane %v2712_v6, 2  ;;  %v1727_v5 = vrot.slane %v1688_v14, 2  ;;  %v3946_v63 = vrot.slane %v2716_v15, 2 }
  0xed   :  { %4068 = vst [vmem:[#allocation34_spill] sm:$0xff] %v2749_v17  ;;  %v2756_v10 = vsel %vm735_vm3, %v1721_v39, %v3941_v7  ;;  %v457_v0 = vrot.slane %v2660_v41, %v2451_v21  ;;  %v464_v60 = vrot.slane %v2663_v26, %v2451_v21  ;;  %v471_v18 = vrot.slane %v449_v58, %v2451_v21 }
  0xee   :  { %4069 = vst [vmem:[#allocation35_spill] sm:$0xff] %v2756_v10  ;;  %v2766_v62 = vsel %vm735_vm3, %v1724_v46, %v3945_v37  ;;  %v2771_v14 = vsel %vm735_vm3, %v1727_v5, %v3946_v63  ;;  %v478_v39 = vrot.slane %v450_v24, %v2451_v21  ;;  %v4072_v41 = vcombine.high %v2497_v55, %v2497_v55 }
  0xef   :  { %4070 = vst [vmem:[#allocation36_spill] sm:$0xff] %v2766_v62  ;;  %4071 = vst [vmem:[#allocation37_spill] sm:$0xff] %v2771_v14  ;;  %v479_v26 = vcombine.high %v457_v0, %v457_v0  ;;  %v480_v13 = vcombine.high %v464_v60, %v464_v60  ;;  %v481_v58 = vcombine.high %v471_v18, %v471_v18 }
  0xf0   :  { %v1782_v7 = vrot.slane %v4072_v41, %v2451_v21  ;;  %v486_v61 = vrot.slane %v457_v0, %v2454_v25  ;;  %v482_v4 = vcombine.high %v478_v39, %v478_v39  ;;  %v490_v46 = vrot.slane %v471_v18, %v2454_v25 }
  0xf1   :  { %v502_v37 = vrot.slane %v464_v60, %v2454_v25  ;;  %v506_v5 = vrot.slane %v478_v39, %v2454_v25  ;;  %v494_v63 = vrot.slane %v479_v26, %v2454_v25  ;;  %v498_v24 = vrot.slane %v481_v58, %v2454_v25 }
  0xf2   :  { %v510_v15 = vrot.slane %v480_v13, %v2454_v25  ;;  %v2786_v55 = vmul.f32 %v486_v61, %v2574_v45  ;;  %v514_v41 = vrot.slane %v482_v4, %v2454_v25  ;;  %v2790_v0 = vmul.f32 %v486_v61, %v2588_v56 }
  0xf3   :  { %v2793_v18 = vmul.f32 %v490_v46, %v2574_v45  ;;  %v2796_v60 = vmul.f32 %v490_v46, %v2588_v56  ;;  %v2799_v39 = vmul.f32 %v494_v63, %v2574_v45  ;;  %v2802_v26 = vmul.f32 %v494_v63, %v2588_v56 }
  0xf4   :  { %v2805_v13 = vmul.f32 %v498_v24, %v2574_v45  ;;  %v2808_v4 = vmul.f32 %v498_v24, %v2588_v56  ;;  %v2811_v61 = vmul.f32 %v502_v37, %v2574_v45  ;;  %v2814_v58 = vmul.f32 %v502_v37, %v2588_v56 }
  0xf5   :  { %v2817_v46 = vmul.f32 %v506_v5, %v2574_v45  ;;  %v2820_v14 = vmul.f32 %v506_v5, %v2588_v56  ;;  %v2823_v63 = vmul.f32 %v510_v15, %v2574_v45  ;;  %v2826_v6 = vmul.f32 %v510_v15, %v2588_v56  ;;  %v2868_v5 = vld [vmem:[%s3916_s1 + $0x30] sm:$0xff] }
  0xf6   :  { %4073 = vst [vmem:[#allocation38_spill] sm:$0xff] %v2811_v61  ;;  %v2829_v24 = vmul.f32 %v514_v41, %v2574_v45  ;;  %v2832_v62 = vmul.f32 %v514_v41, %v2588_v56  ;;  %v1783_v15 = vcombine.high %v2671_v42, %v2671_v42  ;;  %v1784_v16 = vcombine.high %v1782_v7, %v1782_v7 }
  0xf7   :  { %4074 = vst [vmem:[#allocation39_spill] sm:$0xff] %v2817_v46  ;;  %4075 = vst [vmem:[#allocation40_spill] sm:$0xff] %v2820_v14  ;;  %v1791_v43 = vrot.slane %v2671_v42, %v2451_v21  ;;  %v1798_v41 = vrot.slane %v1782_v7, %v2451_v21  ;;  %v614_v37 = vcombine.high %v2514_v2, %v2514_v2  ;;  %v2873_v42 = vld [vmem:[%s3916_s1 + $0x38] sm:$0xff] }
  0xf8   :  { %4076 = vst [vmem:[#allocation41_spill] sm:$0xff] %v2823_v63  ;;  %4077 = vst [vmem:[#allocation42_spill] sm:$0xff] %v2826_v6  ;;  %v621_v10 = vrot.slane %v2514_v2, %v2451_v21  ;;  %v1891_v19 = vcombine.high %v2538_v11, %v2538_v11  ;;  %v2863_v17 = vrot.slane %v2538_v11, %v2451_v21 }
  0xf9   :  { %4078 = vst [vmem:[#allocation43_spill] sm:$0xff] %v2829_v24  ;;  %4079 = vst [vmem:[#allocation44_spill] sm:$0xff] %v2832_v62  ;;  %v1805_v7 = vrot.slane %v1783_v15, %v2451_v21  ;;  %v1812_v2 = vrot.slane %v1784_v16, %v2451_v21  ;;  %v1813_v9 = vcombine.high %v1791_v43, %v1791_v43 }
  0xfa   :  { %v1814_v47 = vcombine.high %v1798_v41, %v1798_v41  ;;  %v1820_v8 = vrot.slane %v1791_v43, %v2454_v25  ;;  %v1836_v11 = vrot.slane %v1798_v41, %v2454_v25  ;;  %v628_v20 = vrot.slane %v614_v37, %v2451_v21 }
  0xfb   :  { %v629_v36 = vcombine.high %v621_v10, %v621_v10  ;;  %v1815_v29 = vcombine.high %v1805_v7, %v1805_v7  ;;  %v1816_v35 = vcombine.high %v1812_v2, %v1812_v2  ;;  %v1824_v53 = vrot.slane %v1805_v7, %v2454_v25 }
  0xfc   :  { %v1828_v54 = vrot.slane %v1813_v9, %v2454_v25  ;;  %v1840_v27 = vrot.slane %v1812_v2, %v2454_v25  ;;  %v1844_v15 = vrot.slane %v1814_v47, %v2454_v25  ;;  %v2885_v16 = vmul.f32 %v2868_v5, %v1820_v8 }
  0xfd   :  { %v2888_v43 = vmul.f32 %v2873_v42, %v1820_v8  ;;  %v1832_v41 = vrot.slane %v1815_v29, %v2454_v25  ;;  %v1848_v37 = vrot.slane %v1816_v35, %v2454_v25  ;;  %v2893_v12 = vmul.f32 %v2868_v5, %v1824_v53 }
  0xfe   :  { %4080 = vst [vmem:[#allocation45_spill] sm:$0xff] %v2885_v16  ;;  %v2896_v7 = vmul.f32 %v2873_v42, %v1824_v53  ;;  %v2899_v9 = vmul.f32 %v2868_v5, %v1828_v54  ;;  %v2902_v47 = vmul.f32 %v2873_v42, %v1828_v54  ;;  %v2905_v2 = vmul.f32 %v2868_v5, %v1836_v11 }
  0xff   :  { %4081 = vst [vmem:[#allocation46_spill] sm:$0xff] %v2888_v43  ;;  %4082 = vst [vmem:[#allocation47_spill] sm:$0xff] %v2893_v12  ;;  %v2908_v8 = vmul.f32 %v2873_v42, %v1836_v11  ;;  %v2911_v29 = vmul.f32 %v2868_v5, %v1832_v41  ;;  %v2914_v35 = vmul.f32 %v2873_v42, %v1832_v41 }
 0x100   :  { %4083 = vst [vmem:[#allocation48_spill] sm:$0xff] %v2896_v7  ;;  %4084 = vst [vmem:[#allocation49_spill] sm:$0xff] %v2899_v9  ;;  %v2917_v53 = vmul.f32 %v2868_v5, %v1840_v27  ;;  %v2920_v9 = vmul.f32 %v2873_v42, %v1840_v27  ;;  %v2923_v54 = vmul.f32 %v2868_v5, %v1844_v15 }
 0x101   :  { %4085 = vst [vmem:[#allocation50_spill] sm:$0xff] %v2902_v47  ;;  %4086 = vst [vmem:[#allocation51_spill] sm:$0xff] %v2905_v2  ;;  %v2926_v2 = vmul.f32 %v2873_v42, %v1844_v15  ;;  %v2929_v11 = vmul.f32 %v2868_v5, %v1848_v37  ;;  %v630_v41 = vcombine.high %v628_v20, %v628_v20 }
 0x102   :  { %4087 = vst [vmem:[#allocation52_spill] sm:$0xff] %v2908_v8  ;;  %4088 = vst [vmem:[#allocation53_spill] sm:$0xff] %v2911_v29  ;;  %v2932_v8 = vmul.f32 %v2873_v42, %v1848_v37  ;;  %v651_v27 = vrot.slane %v629_v36, %v2451_v21  ;;  %v1914_v15 = vrot.slane %v2863_v17, %v2451_v21 }
 0x103   :  { %4089 = vst [vmem:[#allocation54_spill] sm:$0xff] %v2914_v35  ;;  %4090 = vst [vmem:[#allocation55_spill] sm:$0xff] %v2917_v53  ;;  %v637_v35 = vrot.slane %v621_v10, %v2451_v21  ;;  %v644_v53 = vrot.slane %v628_v20, %v2451_v21  ;;  %v658_v37 = vrot.slane %v630_v41, %v2451_v21 }
 0x104   :  { %4091 = vst [vmem:[#allocation56_spill] sm:$0xff] %v2920_v9  ;;  %4092 = vst [vmem:[#allocation57_spill] sm:$0xff] %v2923_v54  ;;  %v1905_v9 = vrot.slane %v1891_v19, %v2451_v21  ;;  %v1906_v54 = vcombine.high %v2863_v17, %v2863_v17  ;;  %v661_v10 = vcombine.high %v651_v27, %v651_v27 }
 0x105   :  { %4093 = vst [vmem:[#allocation58_spill] sm:$0xff] %v2926_v2  ;;  %4094 = vst [vmem:[#allocation59_spill] sm:$0xff] %v2929_v11  ;;  %v660_v2 = vcombine.high %v644_v53, %v644_v53  ;;  %v666_v20 = vrot.slane %v637_v35, %v2454_v25  ;;  %v670_v36 = vrot.slane %v651_v27, %v2454_v25 }
 0x106   :  { %4095 = vst [vmem:[#allocation60_spill] sm:$0xff] %v2932_v8  ;;  %v659_v8 = vcombine.high %v637_v35, %v637_v35  ;;  %v682_v19 = vrot.slane %v644_v53, %v2454_v25  ;;  %v1907_v29 = vcombine.high %v1905_v9, %v1905_v9  ;;  %v662_v47 = vcombine.high %v658_v37, %v658_v37 }
 0x107   :  { %v678_v17 = vrot.slane %v661_v10, %v2454_v25  ;;  %v686_v12 = vrot.slane %v658_v37, %v2454_v25  ;;  %v690_v11 = vrot.slane %v660_v2, %v2454_v25  ;;  %v2953_v41 = vmul.f32 %v666_v20, %v2574_v45 }
 0x108   :  { %v674_v7 = vrot.slane %v659_v8, %v2454_v25  ;;  %v2956_v43 = vmul.f32 %v666_v20, %v2588_v56  ;;  %v2959_v35 = vmul.f32 %v670_v36, %v2574_v45  ;;  %v694_v53 = vrot.slane %v662_v47, %v2454_v25 }
 0x109   :  { %v2963_v27 = vmul.f32 %v670_v36, %v2588_v56  ;;  %v2972_v2 = vmul.f32 %v678_v17, %v2574_v45  ;;  %v2975_v10 = vmul.f32 %v678_v17, %v2588_v56  ;;  %v2978_v20 = vmul.f32 %v682_v19, %v2574_v45 }
 0x10a   :  { %4096 = vst [vmem:[#allocation61_spill] sm:$0xff] %v2959_v35  ;;  %v2966_v8 = vmul.f32 %v674_v7, %v2574_v45  ;;  %v2969_v37 = vmul.f32 %v674_v7, %v2588_v56  ;;  %v2981_v47 = vmul.f32 %v682_v19, %v2588_v56  ;;  %v2984_v36 = vmul.f32 %v686_v12, %v2574_v45 }
 0x10b   :  { %4097 = vst [vmem:[#allocation62_spill] sm:$0xff] %v2963_v27  ;;  %4100 = vst [vmem:[#allocation65_spill] sm:$0xff] %v2972_v2  ;;  %v2987_v16 = vmul.f32 %v686_v12, %v2588_v56  ;;  %v2990_v7 = vmul.f32 %v690_v11, %v2574_v45  ;;  %v2993_v24 = vmul.f32 %v690_v11, %v2588_v56 }
 0x10c   :  { %4098 = vst [vmem:[#allocation63_spill] sm:$0xff] %v2966_v8  ;;  %4099 = vst [vmem:[#allocation64_spill] sm:$0xff] %v2969_v37  ;;  %v2996_v17 = vmul.f32 %v694_v53, %v2574_v45  ;;  %v2999_v62 = vmul.f32 %v694_v53, %v2588_v56  ;;  %v1921_v11 = vrot.slane %v1905_v9, %v2451_v21 }
 0x10d   :  { %4101 = vst [vmem:[#allocation66_spill] sm:$0xff] %v2975_v10  ;;  %4102 = vst [vmem:[#allocation67_spill] sm:$0xff] %v2978_v20  ;;  %v1928_v45 = vrot.slane %v1906_v54, %v2451_v21  ;;  %v1935_v61 = vrot.slane %v1907_v29, %v2451_v21  ;;  %v1936_v56 = vcombine.high %v1914_v15, %v1914_v15 }
 0x10e   :  { %4103 = vst [vmem:[#allocation68_spill] sm:$0xff] %v2981_v47  ;;  %4104 = vst [vmem:[#allocation69_spill] sm:$0xff] %v2984_v36  ;;  %v1943_v53 = vrot.slane %v1914_v15, %v2454_v25  ;;  %v805_v19 = vrot.slane %v2554_v23, %v2451_v21  ;;  %v1937_v6 = vcombine.high %v1921_v11, %v1921_v11 }
 0x10f   :  { %4105 = vst [vmem:[#allocation70_spill] sm:$0xff] %v2987_v16  ;;  %4106 = vst [vmem:[#allocation71_spill] sm:$0xff] %v2990_v7  ;;  %v1938_v63 = vcombine.high %v1928_v45, %v1928_v45  ;;  %v1947_v12 = vrot.slane %v1928_v45, %v2454_v25  ;;  %v1959_v46 = vrot.slane %v1921_v11, %v2454_v25 }
 0x110   :  { %4107 = vst [vmem:[#allocation72_spill] sm:$0xff] %v2993_v24  ;;  %4108 = vst [vmem:[#allocation73_spill] sm:$0xff] %v2996_v17  ;;  %v1939_v14 = vcombine.high %v1935_v61, %v1935_v61  ;;  %v1951_v9 = vrot.slane %v1936_v56, %v2454_v25  ;;  %v1963_v54 = vrot.slane %v1935_v61, %v2454_v25 }
 0x111   :  { %4109 = vst [vmem:[#allocation74_spill] sm:$0xff] %v2999_v62  ;;  %v1980_v17 = vmul.f32 %v2868_v5, %v1943_v53  ;;  %v1955_v29 = vrot.slane %v1938_v63, %v2454_v25  ;;  %v1967_v15 = vrot.slane %v1937_v6, %v2454_v25  ;;  %v3031_v62 = vmul.f32 %v2873_v42, %v1943_v53 }
 0x112   :  { %v1982_v7 = vmul.f32 %v2868_v5, %v1947_v12  ;;  %v1971_v45 = vrot.slane %v1939_v14, %v2454_v25  ;;  %v3036_v11 = vmul.f32 %v2873_v42, %v1947_v12  ;;  %v1984_v56 = vmul.f32 %v2868_v5, %v1951_v9 }
 0x113   :  { %4110 = vst [vmem:[#allocation75_spill] sm:$0xff] %v3031_v62  ;;  %v3040_v61 = vmul.f32 %v2873_v42, %v1951_v9  ;;  %v1986_v24 = vmul.f32 %v2868_v5, %v1955_v29  ;;  %v3044_v63 = vmul.f32 %v2873_v42, %v1955_v29  ;;  %v1988_v6 = vmul.f32 %v2868_v5, %v1959_v46 }
 0x114   :  { %4111 = vst [vmem:[#allocation76_spill] sm:$0xff] %v3036_v11  ;;  %v3048_v53 = vmul.f32 %v2873_v42, %v1959_v46  ;;  %v1990_v14 = vmul.f32 %v2868_v5, %v1963_v54  ;;  %v3052_v12 = vmul.f32 %v2873_v42, %v1963_v54  ;;  %v1992_v36 = vmul.f32 %v2868_v5, %v1967_v15 }
 0x115   :  { %4112 = vst [vmem:[#allocation77_spill] sm:$0xff] %v3040_v61  ;;  %4113 = vst [vmem:[#allocation78_spill] sm:$0xff] %v3044_v63  ;;  %v3056_v9 = vmul.f32 %v2873_v42, %v1967_v15  ;;  %v1994_v16 = vmul.f32 %v2868_v5, %v1971_v45  ;;  %v3060_v29 = vmul.f32 %v2873_v42, %v1971_v45  ;;  %v2012_v20 = vrot.slane %v1980_v17, 1 }
 0x116   :  { %4114 = vst [vmem:[#allocation79_spill] sm:$0xff] %v3048_v53  ;;  %4115 = vst [vmem:[#allocation80_spill] sm:$0xff] %v3052_v12  ;;  %v3989_v47 = vrot.slane %v3031_v62, 1  ;;  %v2015_v46 = vrot.slane %v1982_v7, 1  ;;  %v3991_v2 = vrot.slane %v3036_v11, 1  ;;  %v2018_v10 = vrot.slane %v1984_v56, 1 }
 0x117   :  { %4116 = vst [vmem:[#allocation81_spill] sm:$0xff] %v3056_v9  ;;  %4117 = vst [vmem:[#allocation82_spill] sm:$0xff] %v3060_v29  ;;  %v3990_v54 = vrot.slane %v3040_v61, 1  ;;  %v2021_v15 = vrot.slane %v1986_v24, 1  ;;  %v3996_v37 = vrot.slane %v3044_v63, 1  ;;  %v2024_v35 = vrot.slane %v1988_v6, 1 }
 0x118   :  { %v3068_v8 = vsel %vm555_vm4, %v2012_v20, %v3989_v47  ;;  %v3074_v17 = vsel %vm555_vm4, %v2015_v46, %v3991_v2  ;;  %v3992_v45 = vrot.slane %v3048_v53, 1  ;;  %v2027_v56 = vrot.slane %v1990_v14, 1 }
 0x119   :  { %4118 = vst [vmem:[#allocation83_spill] sm:$0xff] %v3068_v8  ;;  %4119 = vst [vmem:[#allocation84_spill] sm:$0xff] %v3074_v17  ;;  %v3079_v7 = vsel %vm555_vm4, %v2018_v10, %v3990_v54  ;;  %v3085_v24 = vsel %vm555_vm4, %v2021_v15, %v3996_v37  ;;  %v3995_v20 = vrot.slane %v3052_v12, 1  ;;  %v2030_v6 = vrot.slane %v1992_v36, 1 }
 0x11a   :  { %4120 = vst [vmem:[#allocation85_spill] sm:$0xff] %v3079_v7  ;;  %4121 = vst [vmem:[#allocation86_spill] sm:$0xff] %v3085_v24  ;;  %v3993_v47 = vrot.slane %v3056_v9, 1  ;;  %v3092_v46 = vsel %vm555_vm4, %v2024_v35, %v3992_v45  ;;  %v2033_v10 = vrot.slane %v1994_v16, 1  ;;  %v3994_v54 = vrot.slane %v3060_v29, 1 }
 0x11b   :  { %4122 = vst [vmem:[#allocation87_spill] sm:$0xff] %v3092_v46  ;;  %v4123_v14 = vcombine.high %v2554_v23, %v2554_v23  ;;  %v3102_v15 = vsel %vm555_vm4, %v2027_v56, %v3995_v20  ;;  %v813_v35 = vcombine.high %v805_v19, %v805_v19  ;;  %v821_v16 = vrot.slane %v805_v19, %v2451_v21  ;;  %v3118_v23 = vld [vmem:[%s3916_s1 + $0x10] sm:$0xff]  ;;  %v3126_v19 = vld [vmem:[%s3916_s1 + $0x18] sm:$0xff] }
 0x11c   :  { %4124 = vst [vmem:[#allocation88_spill] sm:$0xff] %v3102_v15  ;;  %v3107_v36 = vsel %vm555_vm4, %v2030_v6, %v3993_v47  ;;  %v3113_v45 = vsel %vm555_vm4, %v2033_v10, %v3994_v54  ;;  %4127 = vst [vmem:[#allocation91_spill] sm:$0xff] %v3118_v23  ;;  %v2070_v6 = vcombine.high %v2564_v34, %v2564_v34 }
 0x11d   :  { %v812_v2 = vrot.slane %v4123_v14, %v2451_v21  ;;  %4125 = vst [vmem:[#allocation89_spill] sm:$0xff] %v3107_v36  ;;  %4126 = vst [vmem:[#allocation90_spill] sm:$0xff] %v3113_v45  ;;  %v835_v47 = vrot.slane %v813_v35, %v2451_v21  ;;  %v843_v10 = vcombine.high %v821_v16, %v821_v16 }
 0x11e   :  { %4128 = vst [vmem:[#allocation92_spill] sm:$0xff] %v3126_v19  ;;  %v850_v54 = vrot.slane %v821_v16, %v2454_v25  ;;  %v2077_v20 = vrot.slane %v2564_v34, %v2451_v21  ;;  %v2084_v45 = vrot.slane %v2070_v6, %v2451_v21  ;;  %v928_v17 = vrot.slane %v2583_v52, %v2451_v21 }
 0x11f   :  { %v814_v56 = vcombine.high %v812_v2, %v812_v2  ;;  %v828_v14 = vrot.slane %v812_v2, %v2451_v21  ;;  %v845_v9 = vcombine.high %v835_v47, %v835_v47  ;;  %v854_v36 = vrot.slane %v835_v47, %v2454_v25 }
 0x120   :  { %v858_v12 = vrot.slane %v843_v10, %v2454_v25  ;;  %v3138_v35 = vmul.f32 %v3118_v23, %v850_v54  ;;  %v2086_v61 = vcombine.high %v2084_v45, %v2084_v45  ;;  %v2093_v7 = vrot.slane %v2077_v20, %v2451_v21 }
 0x121   :  { %v842_v37 = vrot.slane %v814_v56, %v2451_v21  ;;  %v844_v29 = vcombine.high %v828_v14, %v828_v14  ;;  %v866_v2 = vrot.slane %v828_v14, %v2454_v25  ;;  %v3143_v56 = vmul.f32 %v3126_v19, %v850_v54 }
 0x122   :  { %4129 = vst [vmem:[#allocation93_spill] sm:$0xff] %v3138_v35  ;;  %v862_v14 = vrot.slane %v845_v9, %v2454_v25  ;;  %v3147_v6 = vmul.f32 %v3118_v23, %v854_v36  ;;  %v3150_v47 = vmul.f32 %v3126_v19, %v854_v36  ;;  %v3153_v10 = vmul.f32 %v3118_v23, %v858_v12 }
 0x123   :  { %v846_v15 = vcombine.high %v842_v37, %v842_v37  ;;  %v870_v16 = vrot.slane %v842_v37, %v2454_v25  ;;  %v874_v34 = vrot.slane %v844_v29, %v2454_v25  ;;  %4130 = vst [vmem:[#allocation94_spill] sm:$0xff] %v3143_v56  ;;  %v3157_v37 = vmul.f32 %v3126_v19, %v858_v12 }
 0x124   :  { %4131 = vst [vmem:[#allocation95_spill] sm:$0xff] %v3147_v6  ;;  %4132 = vst [vmem:[#allocation96_spill] sm:$0xff] %v3150_v47  ;;  %v3160_v29 = vmul.f32 %v3118_v23, %v866_v2  ;;  %v3163_v54 = vmul.f32 %v3126_v19, %v866_v2  ;;  %v3166_v9 = vmul.f32 %v3118_v23, %v862_v14 }
 0x125   :  { %4133 = vst [vmem:[#allocation97_spill] sm:$0xff] %v3153_v10  ;;  %v878_v53 = vrot.slane %v846_v15, %v2454_v25  ;;  %4134 = vst [vmem:[#allocation98_spill] sm:$0xff] %v3157_v37  ;;  %v3169_v36 = vmul.f32 %v3126_v19, %v862_v14  ;;  %v3172_v46 = vmul.f32 %v3118_v23, %v870_v16 }
 0x126   :  { %4135 = vst [vmem:[#allocation99_spill] sm:$0xff] %v3160_v29  ;;  %4136 = vst [vmem:[#allocation100_spill] sm:$0xff] %v3163_v54  ;;  %v3175_v15 = vmul.f32 %v3126_v19, %v870_v16  ;;  %v3178_v12 = vmul.f32 %v3118_v23, %v874_v34  ;;  %v3181_v63 = vmul.f32 %v3126_v19, %v874_v34 }
 0x127   :  { %4137 = vst [vmem:[#allocation101_spill] sm:$0xff] %v3166_v9  ;;  %4138 = vst [vmem:[#allocation102_spill] sm:$0xff] %v3169_v36  ;;  %v3184_v2 = vmul.f32 %v3118_v23, %v878_v53  ;;  %v3187_v24 = vmul.f32 %v3126_v19, %v878_v53  ;;  %v2085_v14 = vcombine.high %v2077_v20, %v2077_v20 }
 0x128   :  { %4139 = vst [vmem:[#allocation103_spill] sm:$0xff] %v3172_v46  ;;  %4140 = vst [vmem:[#allocation104_spill] sm:$0xff] %v3175_v15  ;;  %v2100_v11 = vrot.slane %v2084_v45, %v2451_v21  ;;  %v921_v16 = vcombine.high %v2583_v52, %v2583_v52  ;;  %v218_v34 = vcombine.high %v2599_v3, %v2599_v3 }
 0x129   :  { %4141 = vst [vmem:[#allocation105_spill] sm:$0xff] %v3178_v12  ;;  %4142 = vst [vmem:[#allocation106_spill] sm:$0xff] %v3181_v63  ;;  %v3199_v62 = vrot.slane %v2599_v3, %v2451_v21  ;;  %v2107_v53 = vrot.slane %v2085_v14, %v2451_v21  ;;  %v2114_v8 = vrot.slane %v2086_v61, %v2451_v21 }
 0x12a   :  { %4143 = vst [vmem:[#allocation107_spill] sm:$0xff] %v3184_v2  ;;  %4144 = vst [vmem:[#allocation108_spill] sm:$0xff] %v3187_v24  ;;  %v2115_v20 = vcombine.high %v2093_v7, %v2093_v7  ;;  %v2116_v24 = vcombine.high %v2100_v11, %v2100_v11  ;;  %v2122_v45 = vrot.slane %v2093_v7, %v2454_v25 }
 0x12b   :  { %v2138_v2 = vrot.slane %v2100_v11, %v2454_v25  ;;  %v935_v63 = vrot.slane %v921_v16, %v2451_v21  ;;  %v936_v52 = vcombine.high %v928_v17, %v928_v17  ;;  %v2117_v12 = vcombine.high %v2107_v53, %v2107_v53 }
 0x12c   :  { %v2118_v15 = vcombine.high %v2114_v8, %v2114_v8  ;;  %v2126_v46 = vrot.slane %v2107_v53, %v2454_v25  ;;  %v2130_v3 = vrot.slane %v2115_v20, %v2454_v25  ;;  %v2142_v54 = vrot.slane %v2114_v8, %v2454_v25 }
 0x12d   :  { %v2146_v14 = vrot.slane %v2116_v24, %v2454_v25  ;;  %v2159_v61 = vmul.f32 %v2868_v5, %v2122_v45  ;;  %v3212_v29 = vmul.f32 %v2873_v42, %v2122_v45  ;;  %v2134_v11 = vrot.slane %v2117_v12, %v2454_v25 }
 0x12e   :  { %v2150_v7 = vrot.slane %v2118_v15, %v2454_v25  ;;  %v2161_v16 = vmul.f32 %v2868_v5, %v2126_v46  ;;  %v3218_v36 = vmul.f32 %v2873_v42, %v2126_v46  ;;  %v2163_v53 = vmul.f32 %v2868_v5, %v2130_v3 }
 0x12f   :  { %4145 = vst [vmem:[#allocation109_spill] sm:$0xff] %v3212_v29  ;;  %v3222_v8 = vmul.f32 %v2873_v42, %v2130_v3  ;;  %v2167_v24 = vmul.f32 %v2868_v5, %v2138_v2  ;;  %v3226_v20 = vmul.f32 %v2873_v42, %v2138_v2  ;;  %v2165_v45 = vmul.f32 %v2868_v5, %v2134_v11 }
 0x130   :  { %4146 = vst [vmem:[#allocation110_spill] sm:$0xff] %v3218_v36  ;;  %v3230_v12 = vmul.f32 %v2873_v42, %v2134_v11  ;;  %v2169_v15 = vmul.f32 %v2868_v5, %v2142_v54  ;;  %v3234_v46 = vmul.f32 %v2873_v42, %v2142_v54  ;;  %v2171_v9 = vmul.f32 %v2868_v5, %v2146_v14 }
 0x131   :  { %4147 = vst [vmem:[#allocation111_spill] sm:$0xff] %v3222_v8  ;;  %4148 = vst [vmem:[#allocation112_spill] sm:$0xff] %v3226_v20  ;;  %v3238_v3 = vmul.f32 %v2873_v42, %v2146_v14  ;;  %v2173_v37 = vmul.f32 %v2868_v5, %v2150_v7  ;;  %v3242_v2 = vmul.f32 %v2873_v42, %v2150_v7  ;;  %v2191_v10 = vrot.slane %v2159_v61, 2 }
 0x132   :  { %4149 = vst [vmem:[#allocation113_spill] sm:$0xff] %v3230_v12  ;;  %4150 = vst [vmem:[#allocation114_spill] sm:$0xff] %v3234_v46  ;;  %v4012_v47 = vrot.slane %v3212_v29, 2  ;;  %v2194_v11 = vrot.slane %v2161_v16, 2  ;;  %v4007_v6 = vrot.slane %v3218_v36, 2  ;;  %v2197_v56 = vrot.slane %v2163_v53, 2 }
 0x133   :  { %4151 = vst [vmem:[#allocation115_spill] sm:$0xff] %v3238_v3  ;;  %4152 = vst [vmem:[#allocation116_spill] sm:$0xff] %v3242_v2  ;;  %v4009_v54 = vrot.slane %v3222_v8, 2  ;;  %v2200_v35 = vrot.slane %v2165_v45, 2  ;;  %v4008_v27 = vrot.slane %v3230_v12, 2  ;;  %v2203_v42 = vrot.slane %v2167_v24, 2 }
 0x134   :  { %v3251_v14 = vsel %vm735_vm3, %v2191_v10, %v4012_v47  ;;  %v3256_v5 = vsel %vm735_vm3, %v2194_v11, %v4007_v6  ;;  %v4011_v61 = vrot.slane %v3226_v20, 2  ;;  %v2206_v10 = vrot.slane %v2169_v15, 2 }
 0x135   :  { %4153 = vst [vmem:[#allocation117_spill] sm:$0xff] %v3251_v14  ;;  %4154 = vst [vmem:[#allocation118_spill] sm:$0xff] %v3256_v5  ;;  %v3262_v7 = vsel %vm735_vm3, %v2197_v56, %v4009_v54  ;;  %v3267_v16 = vsel %vm735_vm3, %v2200_v35, %v4008_v27  ;;  %v4010_v53 = vrot.slane %v3234_v46, 2  ;;  %v2209_v24 = vrot.slane %v2171_v9, 2 }
 0x136   :  { %4155 = vst [vmem:[#allocation119_spill] sm:$0xff] %v3262_v7  ;;  %4156 = vst [vmem:[#allocation120_spill] sm:$0xff] %v3267_v16  ;;  %v3273_v45 = vsel %vm735_vm3, %v2203_v42, %v4011_v61  ;;  %v4014_v11 = vrot.slane %v3238_v3, 2  ;;  %v2212_v6 = vrot.slane %v2173_v37, 2  ;;  %v4016_v35 = vrot.slane %v3242_v2, 2 }
 0x137   :  { %4157 = vst [vmem:[#allocation121_spill] sm:$0xff] %v3273_v45  ;;  %v3279_v56 = vsel %vm735_vm3, %v2206_v10, %v4010_v53  ;;  %v937_v27 = vcombine.high %v935_v63, %v935_v63  ;;  %v944_v15 = vrot.slane %v928_v17, %v2451_v21  ;;  %v951_v9 = vrot.slane %v935_v63, %v2451_v21 }
 0x138   :  { %4158 = vst [vmem:[#allocation122_spill] sm:$0xff] %v3279_v56  ;;  %v3286_v54 = vsel %vm735_vm3, %v2209_v24, %v4014_v11  ;;  %v958_v42 = vrot.slane %v936_v52, %v2451_v21  ;;  %v232_v37 = vrot.slane %v218_v34, %v2451_v21  ;;  %v3294_v10 = vsel %vm735_vm3, %v2212_v6, %v4016_v35 }
 0x139   :  { %4159 = vst [vmem:[#allocation123_spill] sm:$0xff] %v3286_v54  ;;  %4160 = vst [vmem:[#allocation124_spill] sm:$0xff] %v3294_v10  ;;  %v965_v53 = vrot.slane %v937_v27, %v2451_v21  ;;  %v966_v61 = vcombine.high %v944_v15, %v944_v15  ;;  %v973_v17 = vrot.slane %v944_v15, %v2454_v25  ;;  %v4166_v5 = vrot.slane %v2796_v60, 1 }
 0x13a   :  { %v967_v47 = vcombine.high %v951_v9, %v951_v9  ;;  %v968_v3 = vcombine.high %v958_v42, %v958_v42  ;;  %v977_v24 = vrot.slane %v958_v42, %v2454_v25  ;;  %v989_v63 = vrot.slane %v951_v9, %v2454_v25 }
 0x13b   :  { %v969_v11 = vcombine.high %v965_v53, %v965_v53  ;;  %v981_v52 = vrot.slane %v966_v61, %v2454_v25  ;;  %v993_v34 = vrot.slane %v965_v53, %v2454_v25  ;;  %v1010_v2 = vmul.f32 %v3118_v23, %v973_v17 }
 0x13c   :  { %v985_v6 = vrot.slane %v968_v3, %v2454_v25  ;;  %v997_v27 = vrot.slane %v967_v47, %v2454_v25  ;;  %v3306_v35 = vmul.f32 %v3126_v19, %v973_v17  ;;  %v1012_v15 = vmul.f32 %v3118_v23, %v977_v24 }
 0x13d   :  { %v1001_v42 = vrot.slane %v969_v11, %v2454_v25  ;;  %v3311_v9 = vmul.f32 %v3126_v19, %v977_v24  ;;  %v1014_v61 = vmul.f32 %v3118_v23, %v981_v52  ;;  %v3315_v53 = vmul.f32 %v3126_v19, %v981_v52 }
 0x13e   :  { %v1016_v10 = vmul.f32 %v3118_v23, %v985_v6  ;;  %v3319_v3 = vmul.f32 %v3126_v19, %v985_v6  ;;  %v1018_v47 = vmul.f32 %v3118_v23, %v989_v63  ;;  %v3323_v17 = vmul.f32 %v3126_v19, %v989_v63 }
 0x13f   :  { %v1020_v11 = vmul.f32 %v3118_v23, %v993_v34  ;;  %v3327_v24 = vmul.f32 %v3126_v19, %v993_v34  ;;  %v1022_v54 = vmul.f32 %v3118_v23, %v997_v27  ;;  %v3331_v52 = vmul.f32 %v3126_v19, %v997_v27 }
 0x140   :  { %v1024_v46 = vmul.f32 %v3118_v23, %v1001_v42  ;;  %v3335_v6 = vmul.f32 %v3126_v19, %v1001_v42  ;;  %v1042_v56 = vrot.slane %v1010_v2, 1  ;;  %v4021_v20 = vrot.slane %v3306_v35, 1 }
 0x141   :  { %v1045_v63 = vrot.slane %v1012_v15, 1  ;;  %v4025_v45 = vrot.slane %v3311_v9, 1  ;;  %v1048_v12 = vrot.slane %v1014_v61, 1  ;;  %v4022_v34 = vrot.slane %v3315_v53, 1 }
 0x142   :  { %v3343_v16 = vsel %vm555_vm4, %v1042_v56, %v4021_v20  ;;  %v1051_v27 = vrot.slane %v1016_v10, 1  ;;  %v4023_v8 = vrot.slane %v3319_v3, 1  ;;  %v1054_v7 = vrot.slane %v1018_v47, 1 }
 0x143   :  { %v3349_v2 = vsel %vm555_vm4, %v1045_v63, %v4025_v45  ;;  %v3354_v15 = vsel %vm555_vm4, %v1048_v12, %v4022_v34  ;;  %v4024_v42 = vrot.slane %v3323_v17, 1  ;;  %v1057_v61 = vrot.slane %v1020_v11, 1 }
 0x144   :  { %v3360_v56 = vsel %vm555_vm4, %v1051_v27, %v4023_v8  ;;  %v4026_v10 = vrot.slane %v3327_v24, 1  ;;  %v1060_v47 = vrot.slane %v1022_v54, 1  ;;  %v4027_v20 = vrot.slane %v3331_v52, 1 }
 0x145   :  { %v3367_v63 = vsel %vm555_vm4, %v1054_v7, %v4024_v42  ;;  %v1063_v12 = vrot.slane %v1024_v46, 1  ;;  %v4029_v34 = vrot.slane %v3335_v6, 1  ;;  %v233_v11 = vcombine.high %v3199_v62, %v3199_v62 }
 0x146   :  { %v3375_v27 = vsel %vm555_vm4, %v1057_v61, %v4026_v10  ;;  %v3380_v54 = vsel %vm555_vm4, %v1060_v47, %v4027_v20  ;;  %v234_v8 = vcombine.high %v232_v37, %v232_v37  ;;  %v241_v7 = vrot.slane %v3199_v62, %v2451_v21 }
 0x147   :  { %4161 = vst [vmem:[#allocation125_spill] sm:$0xff] %v3375_v27  ;;  %4162 = vst [vmem:[#allocation126_spill] sm:$0xff] %v3380_v54  ;;  %v3387_v46 = vsel %vm555_vm4, %v1063_v12, %v4029_v34  ;;  %v248_v42 = vrot.slane %v232_v37, %v2451_v21  ;;  %v255_v45 = vrot.slane %v233_v11, %v2451_v21  ;;  %v4164_v61 = vrot.slane %v2790_v0, 1 }
 0x148   :  { %4163 = vst [vmem:[#allocation127_spill] sm:$0xff] %v3387_v46  ;;  %v4165_v10 = vrot.slane %v2786_v55, 1  ;;  %v262_v20 = vrot.slane %v234_v8, %v2451_v21  ;;  %v263_v36 = vcombine.high %v241_v7, %v241_v7  ;;  %v270_v62 = vrot.slane %v241_v7, %v2454_v25 }
 0x149   :  { %v4167_v12 = vrot.slane %v2793_v18, 1  ;;  %v264_v37 = vcombine.high %v248_v42, %v248_v42  ;;  %v265_v29 = vcombine.high %v255_v45, %v255_v45  ;;  %v274_v11 = vrot.slane %v255_v45, %v2454_v25 }
 0x14a   :  { %v558_v47 = vsel %vm555_vm4, %v4165_v10, %v4164_v61  ;;  %v286_v14 = vrot.slane %v248_v42, %v2454_v25  ;;  %v266_v55 = vcombine.high %v262_v20, %v262_v20  ;;  %v278_v10 = vrot.slane %v263_v36, %v2454_v25 }
 0x14b   :  { %v561_v34 = vsel %vm555_vm4, %v4167_v12, %v4166_v5  ;;  %v290_v8 = vrot.slane %v262_v20, %v2454_v25  ;;  %v416_v61 = vadd.f32 %v2604_v51, %v270_v62  ;;  %v282_v7 = vrot.slane %v265_v29, %v2454_v25 }
 0x14c   :  { %v294_v19 = vrot.slane %v264_v37, %v2454_v25  ;;  %v417_v18 = vadd.f32 %v2609_v40, %v270_v62  ;;  %v418_v5 = vadd.f32 %v2612_v48, %v274_v11  ;;  %v298_v12 = vrot.slane %v266_v55, %v2454_v25 }
 0x14d   :  { %v419_v45 = vadd.f32 %v2618_v57, %v274_v11  ;;  %v420_v42 = vadd.f32 %v2621_v32, %v278_v10  ;;  %v421_v36 = vadd.f32 %v2624_v59, %v278_v10  ;;  %v422_v20 = vadd.f32 %v2627_v50, %v282_v7  ;;  %v4177_v11 = vld [vmem:[#allocation39_spill] sm:$0xff]  ;;  %v4179_v10 = vld [vmem:[#allocation42_spill] sm:$0xff] }
 0x14e   :  { %v423_v51 = vadd.f32 %v2630_v44, %v282_v7  ;;  %v424_v29 = vadd.f32 %v2633_v49, %v286_v14  ;;  %v425_v37 = vadd.f32 %v2636_v22, %v286_v14  ;;  %v426_v40 = vadd.f32 %v2639_v38, %v290_v8  ;;  %v4173_v14 = vld [vmem:[#allocation38_spill] sm:$0xff]  ;;  %v4181_v7 = vld [vmem:[#allocation41_spill] sm:$0xff] }
 0x14f   :  { %v427_v48 = vadd.f32 %v2642_v30, %v290_v8  ;;  %v428_v62 = vadd.f32 %v2645_v1, %v294_v19  ;;  %v429_v57 = vadd.f32 %v2648_v31, %v294_v19  ;;  %v430_v32 = vadd.f32 %v2651_v33, %v298_v12  ;;  %v4175_v19 = vld [vmem:[#allocation40_spill] sm:$0xff] }
 0x150   :  { %v431_v59 = vadd.f32 %v2654_v28, %v298_v12  ;;  %v4168_v50 = vrot.slane %v2802_v26, 1  ;;  %v4169_v44 = vrot.slane %v2799_v39, 1  ;;  %v4170_v22 = vrot.slane %v2808_v4, 1 }
 0x151   :  { %v4171_v38 = vrot.slane %v2805_v13, 1  ;;  %v4172_v1 = vrot.slane %v2814_v58, 1  ;;  %v4174_v31 = vrot.slane %v4173_v14, 1  ;;  %v4176_v28 = vrot.slane %v4175_v19, 1 }
 0x152   :  { %v564_v49 = vsel %vm555_vm4, %v4169_v44, %v4168_v50  ;;  %v4178_v55 = vrot.slane %v4177_v11, 1  ;;  %v4180_v8 = vrot.slane %v4179_v10, 1  ;;  %v4182_v12 = vrot.slane %v4181_v7, 1  ;;  %v4183_v50 = vld [vmem:[#allocation44_spill] sm:$0xff] }
 0x153   :  { %v567_v30 = vsel %vm555_vm4, %v4171_v38, %v4170_v22  ;;  %v570_v33 = vsel %vm555_vm4, %v4174_v31, %v4172_v1  ;;  %v4184_v44 = vrot.slane %v4183_v50, 1  ;;  %v4185_v22 = vld [vmem:[#allocation43_spill] sm:$0xff]  ;;  %v596_v23 = vadd.f32 %v558_v47, %v416_v61 }
 0x154   :  { %v573_v39 = vsel %vm555_vm4, %v4178_v55, %v4176_v28  ;;  %v576_v13 = vsel %vm555_vm4, %v4182_v12, %v4180_v8  ;;  %v4186_v38 = vrot.slane %v4185_v22, 1  ;;  %v4187_v1 = vrot.slane %v2790_v0, 1 }
 0x155   :  { %v598_v25 = vadd.f32 %v561_v34, %v418_v5  ;;  %v4188_v11 = vrot.slane %v2796_v60, 1  ;;  %v600_v55 = vadd.f32 %v564_v49, %v420_v42  ;;  %v4189_v46 = vrot.slane %v2802_v26, 1  ;;  %v4207_v49 = vld [vmem:[#allocation65_spill] sm:$0xff] }
 0x156   :  { %v579_v14 = vsel %vm555_vm4, %v4186_v38, %v4184_v44  ;;  %v597_v31 = vadd.f32 %v4187_v1, %v417_v18  ;;  %v602_v54 = vadd.f32 %v567_v30, %v422_v20  ;;  %v4190_v8 = vrot.slane %v2808_v4, 1  ;;  %v4199_v20 = vld [vmem:[#allocation61_spill] sm:$0xff] }
 0x157   :  { %v599_v28 = vadd.f32 %v4188_v11, %v419_v45  ;;  %v601_v7 = vadd.f32 %v4189_v46, %v421_v36  ;;  %v604_v27 = vadd.f32 %v570_v33, %v424_v29  ;;  %v4191_v22 = vrot.slane %v2814_v58, 1  ;;  %v4197_v58 = vld [vmem:[#allocation62_spill] sm:$0xff]  ;;  %v4209_v33 = vld [vmem:[#allocation68_spill] sm:$0xff] }
 0x158   :  { %v603_v12 = vadd.f32 %v4190_v8, %v423_v51  ;;  %v606_v47 = vadd.f32 %v573_v39, %v426_v40  ;;  %v4192_v0 = vrot.slane %v4175_v19, 1  ;;  %v608_v34 = vadd.f32 %v576_v13, %v428_v62  ;;  %v4211_v39 = vld [vmem:[#allocation67_spill] sm:$0xff]  ;;  %v4217_v8 = vld [vmem:[#allocation72_spill] sm:$0xff] }
 0x159   :  { %v605_v44 = vadd.f32 %v4191_v22, %v425_v37  ;;  %v4193_v60 = vrot.slane %v4179_v10, 1  ;;  %v610_v5 = vadd.f32 %v579_v14, %v430_v32  ;;  %v4194_v26 = vrot.slane %v4183_v50, 1  ;;  %v4201_v37 = vld [vmem:[#allocation64_spill] sm:$0xff]  ;;  %v4205_v32 = vld [vmem:[#allocation66_spill] sm:$0xff]  ;;  %v4215_v14 = vld [vmem:[#allocation69_spill] sm:$0xff] }
 0x15a   :  { %v607_v61 = vadd.f32 %v4192_v0, %v427_v48  ;;  %v4195_v45 = vrot.slane %v2956_v43, 2  ;;  %v4196_v4 = vrot.slane %v2953_v41, 2  ;;  %v4198_v36 = vrot.slane %v4197_v58, 2  ;;  %v4203_v48 = vld [vmem:[#allocation63_spill] sm:$0xff]  ;;  %v4213_v50 = vld [vmem:[#allocation70_spill] sm:$0xff] }
 0x15b   :  { %v609_v18 = vadd.f32 %v4193_v60, %v429_v57  ;;  %v611_v46 = vadd.f32 %v4194_v26, %v431_v59  ;;  %v4200_v51 = vrot.slane %v4199_v20, 2  ;;  %v4202_v40 = vrot.slane %v4201_v37, 2  ;;  %v4219_v0 = vld [vmem:[#allocation71_spill] sm:$0xff] }
 0x15c   :  { %v738_v42 = vsel %vm735_vm3, %v4196_v4, %v4195_v45  ;;  %v4204_v62 = vrot.slane %v4203_v48, 2  ;;  %v4206_v59 = vrot.slane %v4205_v32, 2  ;;  %v4208_v30 = vrot.slane %v4207_v49, 2  ;;  %v4221_v45 = vld [vmem:[#allocation74_spill] sm:$0xff] }
 0x15d   :  { %v741_v29 = vsel %vm735_vm3, %v4200_v51, %v4198_v36  ;;  %v4210_v19 = vrot.slane %v4209_v33, 2  ;;  %v4212_v10 = vrot.slane %v4211_v39, 2  ;;  %v4214_v38 = vrot.slane %v4213_v50, 2  ;;  %v4223_v36 = vld [vmem:[#allocation73_spill] sm:$0xff] }
 0x15e   :  { %v744_v57 = vsel %vm735_vm3, %v4204_v62, %v4202_v40  ;;  %v747_v41 = vsel %vm735_vm3, %v4208_v30, %v4206_v59  ;;  %v4216_v1 = vrot.slane %v4215_v14, 2  ;;  %v4218_v22 = vrot.slane %v4217_v8, 2 }
 0x15f   :  { %v750_v13 = vsel %vm735_vm3, %v4212_v10, %v4210_v19  ;;  %v4220_v60 = vrot.slane %v4219_v0, 2  ;;  %v4222_v4 = vrot.slane %v4221_v45, 2  ;;  %v4224_v20 = vrot.slane %v4223_v36, 2 }
 0x160   :  { %v753_v11 = vsel %vm735_vm3, %v4216_v1, %v4214_v38  ;;  %v776_v40 = vadd.f32 %v738_v42, %v596_v23  ;;  %v4225_v48 = vrot.slane %v2956_v43, 2  ;;  %v778_v59 = vadd.f32 %v741_v29, %v598_v25 }
 0x161   :  { %v756_v26 = vsel %vm735_vm3, %v4220_v60, %v4218_v22  ;;  %v759_v51 = vsel %vm735_vm3, %v4224_v20, %v4222_v4  ;;  %v4226_v49 = vrot.slane %v4197_v58, 2  ;;  %v780_v19 = vadd.f32 %v744_v57, %v600_v55  ;;  %v4245_v20 = vld [vmem:[#allocation105_spill] sm:$0xff] }
 0x162   :  { %v777_v62 = vadd.f32 %v4225_v48, %v597_v31  ;;  %v4227_v39 = vrot.slane %v4201_v37, 2  ;;  %v782_v38 = vadd.f32 %v747_v41, %v602_v54  ;;  %v4228_v14 = vrot.slane %v4205_v32, 2  ;;  %v4233_v54 = vld [vmem:[#allocation93_spill] sm:$0xff]  ;;  %v4234_v37 = vld [vmem:[#allocation94_spill] sm:$0xff]  ;;  %v4236_v32 = vld [vmem:[#allocation96_spill] sm:$0xff] }
 0x163   :  { %v779_v30 = vadd.f32 %v4226_v49, %v599_v28  ;;  %v784_v22 = vadd.f32 %v750_v13, %v604_v27  ;;  %v4229_v0 = vrot.slane %v4209_v33, 2  ;;  %v786_v23 = vadd.f32 %v753_v11, %v606_v47  ;;  %v4235_v27 = vld [vmem:[#allocation95_spill] sm:$0xff]  ;;  %v4237_v47 = vld [vmem:[#allocation97_spill] sm:$0xff]  ;;  %v4238_v33 = vld [vmem:[#allocation98_spill] sm:$0xff] }
 0x164   :  { %v781_v10 = vadd.f32 %v4227_v39, %v601_v7  ;;  %v783_v1 = vadd.f32 %v4228_v14, %v603_v12  ;;  %v4230_v43 = vrot.slane %v4213_v50, 2  ;;  %v788_v25 = vadd.f32 %v756_v26, %v608_v34  ;;  %v4239_v34 = vld [vmem:[#allocation101_spill] sm:$0xff]  ;;  %v4240_v50 = vld [vmem:[#allocation102_spill] sm:$0xff]  ;;  %v4243_v26 = vld [vmem:[#allocation103_spill] sm:$0xff] }
 0x165   :  { %v785_v60 = vadd.f32 %v4229_v0, %v605_v44  ;;  %v4231_v42 = vrot.slane %v4217_v8, 2  ;;  %v790_v55 = vadd.f32 %v759_v51, %v610_v5  ;;  %v4232_v58 = vmov %v4222_v4  ;;  %v4241_v5 = vld [vmem:[#allocation99_spill] sm:$0xff]  ;;  %v4242_v8 = vld [vmem:[#allocation100_spill] sm:$0xff] }
 0x166   :  { %v787_v31 = vadd.f32 %v4230_v43, %v607_v61  ;;  %v791_v7 = vadd.f32 %v4232_v58, %v611_v46  ;;  %v903_v29 = vadd.f32 %v4233_v54, %v776_v40  ;;  %v904_v12 = vadd.f32 %v4234_v37, %v777_v62  ;;  %v4244_v4 = vld [vmem:[#allocation104_spill] sm:$0xff]  ;;  %v4246_v40 = vld [vmem:[#allocation106_spill] sm:$0xff]  ;;  %v4247_v62 = vld [vmem:[#allocation107_spill] sm:$0xff] }
 0x167   :  { %v789_v28 = vadd.f32 %v4231_v42, %v609_v18  ;;  %v905_v57 = vadd.f32 %v4235_v27, %v778_v59  ;;  %v906_v44 = vadd.f32 %v4236_v32, %v779_v30  ;;  %v907_v41 = vadd.f32 %v4237_v47, %v780_v19  ;;  %v4248_v49 = vld [vmem:[#allocation108_spill] sm:$0xff]  ;;  %v4258_v58 = vld [vmem:[#allocation125_spill] sm:$0xff] }
 0x168   :  { %v908_v61 = vadd.f32 %v4238_v33, %v781_v10  ;;  %v909_v13 = vadd.f32 %v4239_v34, %v782_v38  ;;  %v910_v18 = vadd.f32 %v4240_v50, %v783_v1  ;;  %v911_v11 = vadd.f32 %v4241_v5, %v784_v22  ;;  %v4257_v42 = vld [vmem:[#allocation20_spill] sm:$0xff]  ;;  %v4261_v27 = vld [vmem:[#allocation29_spill] sm:$0xff]  ;;  %v4266_v50 = vld [vmem:[#allocation3_spill] sm:$0xff] }
 0x169   :  { %v912_v46 = vadd.f32 %v4242_v8, %v785_v60  ;;  %v913_v45 = vadd.f32 %v4243_v26, %v786_v23  ;;  %v914_v36 = vadd.f32 %v4244_v4, %v787_v31  ;;  %v915_v51 = vadd.f32 %v4245_v20, %v788_v25 }
 0x16a   :  { %v916_v48 = vadd.f32 %v4246_v40, %v789_v28  ;;  %v917_v59 = vadd.f32 %v4247_v62, %v790_v55  ;;  %v918_v30 = vadd.f32 %v4248_v49, %v791_v7  ;;  %v4249_v19 = vrot.slane %v3306_v35, 1 }
 0x16b   :  { %v4250_v10 = vrot.slane %v3311_v9, 1  ;;  %v4251_v14 = vrot.slane %v3315_v53, 1  ;;  %v4252_v22 = vrot.slane %v3319_v3, 1  ;;  %v4253_v60 = vrot.slane %v3323_v17, 1 }
 0x16c   :  { %v3546_v39 = vadd.f32 %v4249_v19, %v904_v12  ;;  %v4254_v35 = vrot.slane %v3327_v24, 1  ;;  %v4255_v9 = vrot.slane %v3331_v52, 1  ;;  %v4256_v53 = vrot.slane %v3335_v6, 1  ;;  %v4260_v12 = vld [vmem:[#allocation127_spill] sm:$0xff] }
 0x16d   :  { %v3550_v38 = vadd.f32 %v4250_v10, %v906_v44  ;;  %v3554_v1 = vadd.f32 %v4251_v14, %v908_v61  ;;  %v3558_v0 = vadd.f32 %v4252_v22, %v910_v18  ;;  %v3562_v23 = vadd.f32 %v4253_v60, %v912_v46  ;;  %v4264_v44 = vld [vmem:[#allocation4_spill] sm:$0xff] }
 0x16e   :  { %v3566_v43 = vadd.f32 %v4254_v35, %v914_v36  ;;  %v3570_v31 = vadd.f32 %v4255_v9, %v916_v48  ;;  %v3574_v25 = vadd.f32 %v4256_v53, %v918_v30  ;;  %v1100_v3 = vcombine.high %v4257_v42, %v4257_v42  ;;  %v4268_v48 = vld [vmem:[#allocation92_spill] sm:$0xff] }
 0x16f   :  { %v1107_v17 = vrot.slane %v4257_v42, %v2451_v21  ;;  %v3581_v28 = vadd.f32 %v3343_v16, %v903_v29  ;;  %v3584_v24 = vadd.f32 %v3349_v2, %v905_v57  ;;  %v3587_v52 = vadd.f32 %v3354_v15, %v907_v41  ;;  %v4259_v29 = vld [vmem:[#allocation126_spill] sm:$0xff]  ;;  %v4262_v57 = vld [vmem:[#allocation5_spill] sm:$0xff] }
 0x170   :  { %v3590_v55 = vadd.f32 %v3360_v56, %v909_v13  ;;  %v3593_v6 = vadd.f32 %v3367_v63, %v911_v11  ;;  %v3596_v7 = vadd.f32 %v4258_v58, %v913_v45  ;;  %v1114_v54 = vrot.slane %v1100_v3, %v2451_v21 }
 0x171   :  { %v1115_v37 = vcombine.high %v1107_v17, %v1107_v17  ;;  %v1123_v16 = vrot.slane %v1107_v17, %v2451_v21  ;;  %v3601_v2 = vadd.f32 %v4259_v29, %v915_v51  ;;  %v3604_v15 = vadd.f32 %v4260_v12, %v917_v59  ;;  %v4267_v51 = vld [vmem:[#allocation91_spill] sm:$0xff] }
 0x172   :  { %v1283_v56 = vcombine.high %v4261_v27, %v4261_v27  ;;  %v3610_v63 = vrot.slane %v4261_v27, %v2451_v21  ;;  %v4263_v32 = vrot.slane %v4262_v57, 1  ;;  %v4265_v47 = vrot.slane %v4264_v44, 1 }
 0x173   :  { %v1116_v33 = vcombine.high %v1114_v54, %v1114_v54  ;;  %v1130_v61 = vrot.slane %v1114_v54, %v2451_v21  ;;  %v1137_v34 = vrot.slane %v1115_v37, %v2451_v21  ;;  %v1145_v13 = vcombine.high %v1123_v16, %v1123_v16 }
 0x174   :  { %v3617_v41 = vsel %vm555_vm4, %v4265_v47, %v4263_v32  ;;  %v1152_v18 = vrot.slane %v1123_v16, %v4266_v50  ;;  %v3623_v5 = vrot.slane %v1283_v56, %v2451_v21  ;;  %v1298_v11 = vcombine.high %v3610_v63, %v3610_v63 }
 0x175   :  { %v3629_v8 = vrot.slane %v3610_v63, %v2451_v21  ;;  %v1144_v46 = vrot.slane %v1116_v33, %v2451_v21  ;;  %v1146_v26 = vcombine.high %v1130_v61, %v1130_v61  ;;  %v1147_v45 = vcombine.high %v1137_v34, %v1137_v34 }
 0x176   :  { %v1156_v4 = vrot.slane %v1137_v34, %v4266_v50  ;;  %v1160_v36 = vrot.slane %v1145_v13, %v4266_v50  ;;  %v1168_v20 = vrot.slane %v1130_v61, %v4266_v50  ;;  %v1189_v40 = vmul.f32 %v4267_v51, %v1152_v18 }
 0x177   :  { %v1190_v62 = vmul.f32 %v4268_v48, %v1152_v18  ;;  %v1148_v59 = vcombine.high %v1144_v46, %v1144_v46  ;;  %v1164_v49 = vrot.slane %v1147_v45, %v4266_v50  ;;  %v1172_v30 = vrot.slane %v1144_v46, %v4266_v50 }
 0x178   :  { %v1176_v19 = vrot.slane %v1146_v26, %v4266_v50  ;;  %v1191_v10 = vmul.f32 %v4267_v51, %v1156_v4  ;;  %v1192_v14 = vmul.f32 %v4268_v48, %v1156_v4  ;;  %v1193_v22 = vmul.f32 %v4267_v51, %v1160_v36 }
 0x179   :  { %v1194_v60 = vmul.f32 %v4268_v48, %v1160_v36  ;;  %v1180_v35 = vrot.slane %v1148_v59, %v4266_v50  ;;  %v1195_v9 = vmul.f32 %v4267_v51, %v1164_v49  ;;  %v1196_v53 = vmul.f32 %v4268_v48, %v1164_v49 }
 0x17a   :  { %v1197_v42 = vmul.f32 %v4267_v51, %v1168_v20  ;;  %v1198_v3 = vmul.f32 %v4268_v48, %v1168_v20  ;;  %v1199_v17 = vmul.f32 %v4267_v51, %v1172_v30  ;;  %v1200_v58 = vmul.f32 %v4268_v48, %v1172_v30 }
 0x17b   :  { %v1201_v54 = vmul.f32 %v4267_v51, %v1176_v19  ;;  %v1202_v37 = vmul.f32 %v4268_v48, %v1176_v19  ;;  %v1203_v16 = vmul.f32 %v4267_v51, %v1180_v35  ;;  %v1204_v29 = vmul.f32 %v4268_v48, %v1180_v35 }
 0x17c   :  { %v1221_v12 = vrot.slane %v1189_v40, 2  ;;  %v1222_v27 = vrot.slane %v1190_v62, 2  ;;  %v1224_v56 = vrot.slane %v1191_v10, 2  ;;  %v1225_v32 = vrot.slane %v1192_v14, 2 }
 0x17d   :  { %v1227_v44 = vrot.slane %v1193_v22, 2  ;;  %v1228_v47 = vrot.slane %v1194_v60, 2  ;;  %v1230_v33 = vrot.slane %v1195_v9, 2  ;;  %v1231_v61 = vrot.slane %v1196_v53, 2 }
 0x17e   :  { %v1233_v34 = vrot.slane %v1197_v42, 2  ;;  %v1234_v13 = vrot.slane %v1198_v3, 2  ;;  %v1236_v18 = vrot.slane %v1199_v17, 2  ;;  %v1237_v46 = vrot.slane %v1200_v58, 2 }
 0x17f   :  { %v1239_v26 = vrot.slane %v1201_v54, 2  ;;  %v1240_v45 = vrot.slane %v1202_v37, 2  ;;  %v1242_v4 = vrot.slane %v1203_v16, 2  ;;  %v1243_v36 = vrot.slane %v1204_v29, 2  ;;  %v4275_v54 = vld [vmem:[#allocation8_spill] sm:$0xff]  ;;  %v4279_v29 = vld [vmem:[#allocation10_spill] sm:$0xff] }
 0x180   :  { %v1262_v20 = vadd.f32 %v1222_v27, %v3546_v39  ;;  %v3657_v51 = vadd.f32 %v1225_v32, %v3550_v38  ;;  %v3660_v40 = vadd.f32 %v1228_v47, %v3554_v1  ;;  %v3663_v48 = vadd.f32 %v1231_v61, %v3558_v0 }
 0x181   :  { %v3666_v62 = vadd.f32 %v1234_v13, %v3562_v23  ;;  %v3669_v59 = vadd.f32 %v1237_v46, %v3566_v43  ;;  %v3672_v49 = vadd.f32 %v1240_v45, %v3570_v31  ;;  %v3675_v39 = vadd.f32 %v1243_v36, %v3574_v25 }
 0x182   :  { %v1223_v38 = vsel %vm735_vm3, %v1221_v12, %v1222_v27  ;;  %v1226_v1 = vsel %vm735_vm3, %v1224_v56, %v1225_v32  ;;  %v1229_v30 = vsel %vm735_vm3, %v1227_v44, %v1228_v47  ;;  %v1232_v0 = vsel %vm735_vm3, %v1230_v33, %v1231_v61  ;;  %v2355_v61 = vld [vmem:[%s3916_s1 + $0x20] sm:$0xff] }
 0x183   :  { %v1235_v23 = vsel %vm735_vm3, %v1233_v34, %v1234_v13  ;;  %v1238_v19 = vsel %vm735_vm3, %v1236_v18, %v1237_v46  ;;  %v1241_v43 = vsel %vm735_vm3, %v1239_v26, %v1240_v45  ;;  %v1244_v31 = vsel %vm735_vm3, %v1242_v4, %v1243_v36  ;;  %v2356_v46 = vld [vmem:[%s3916_s1 + $0x28] sm:$0xff] }
 0x184   :  { %v1261_v10 = vadd.f32 %v1223_v38, %v3581_v28  ;;  %v1263_v25 = vadd.f32 %v1226_v1, %v3584_v24  ;;  %v1265_v14 = vadd.f32 %v1229_v30, %v3587_v52  ;;  %v1267_v22 = vadd.f32 %v1232_v0, %v3590_v55 }
 0x185   :  { %v1269_v60 = vadd.f32 %v1235_v23, %v3593_v6  ;;  %v1271_v35 = vadd.f32 %v1238_v19, %v3596_v7  ;;  %v1273_v9 = vadd.f32 %v1241_v43, %v3601_v2  ;;  %v1275_v53 = vadd.f32 %v1244_v31, %v3604_v15  ;;  %v4269_v7 = vld [vmem:[#allocation7_spill] sm:$0xff]  ;;  %v4271_v15 = vld [vmem:[#allocation6_spill] sm:$0xff] }
 0x186   :  { %v1299_v42 = vcombine.high %v3623_v5, %v3623_v5  ;;  %v1313_v28 = vrot.slane %v3623_v5, %v2451_v21  ;;  %v1320_v24 = vrot.slane %v1298_v11, %v2451_v21  ;;  %v1328_v52 = vcombine.high %v3629_v8, %v3629_v8  ;;  %v4273_v5 = vld [vmem:[#allocation9_spill] sm:$0xff]  ;;  %v4277_v11 = vld [vmem:[#allocation11_spill] sm:$0xff] }
 0x187   :  { %v1335_v55 = vrot.slane %v3629_v8, %v4266_v50  ;;  %v4270_v2 = vrot.slane %v4269_v7, 1  ;;  %v4272_v3 = vrot.slane %v4271_v15, 1  ;;  %v4274_v58 = vrot.slane %v4273_v5, 1 }
 0x188   :  { %v1327_v6 = vrot.slane %v1299_v42, %v2451_v21  ;;  %v4276_v37 = vrot.slane %v4275_v54, 1  ;;  %v4278_v16 = vrot.slane %v4277_v11, 1  ;;  %v4280_v12 = vrot.slane %v4279_v29, 1 }
 0x189   :  { %v1532_v17 = vsel %vm555_vm4, %v4272_v3, %v4270_v2  ;;  %v1329_v27 = vcombine.high %v1313_v28, %v1313_v28  ;;  %v1330_v21 = vcombine.high %v1320_v24, %v1320_v24  ;;  %v1339_v56 = vrot.slane %v1320_v24, %v4266_v50 }
 0x18a   :  { %v1535_v63 = vsel %vm555_vm4, %v4276_v37, %v4274_v58  ;;  %v1538_v8 = vsel %vm555_vm4, %v4280_v12, %v4278_v16  ;;  %v1343_v32 = vrot.slane %v1328_v52, %v4266_v50  ;;  %v1331_v44 = vcombine.high %v1327_v6, %v1327_v6 }
 0x18b   :  { %v1351_v47 = vrot.slane %v1313_v28, %v4266_v50  ;;  %v1355_v33 = vrot.slane %v1327_v6, %v4266_v50  ;;  %v1372_v34 = vmul.f32 %v2355_v61, %v1335_v55  ;;  %v1347_v13 = vrot.slane %v1330_v21, %v4266_v50 }
 0x18c   :  { %v1359_v18 = vrot.slane %v1329_v27, %v4266_v50  ;;  %v1373_v26 = vmul.f32 %v2356_v46, %v1335_v55  ;;  %v1374_v45 = vmul.f32 %v2355_v61, %v1339_v56  ;;  %v1363_v4 = vrot.slane %v1331_v44, %v4266_v50 }
 0x18d   :  { %v1375_v36 = vmul.f32 %v2356_v46, %v1339_v56  ;;  %v1376_v38 = vmul.f32 %v2355_v61, %v1343_v32  ;;  %v1377_v1 = vmul.f32 %v2356_v46, %v1343_v32  ;;  %v1378_v30 = vmul.f32 %v2355_v61, %v1347_v13 }
 0x18e   :  { %v1379_v0 = vmul.f32 %v2356_v46, %v1347_v13  ;;  %v1380_v23 = vmul.f32 %v2355_v61, %v1351_v47  ;;  %v1381_v19 = vmul.f32 %v2356_v46, %v1351_v47  ;;  %v1382_v43 = vmul.f32 %v2355_v61, %v1355_v33  ;;  %v4295_v47 = vld [vmem:[#allocation18_spill] sm:$0xff] }
 0x18f   :  { %v1383_v31 = vmul.f32 %v2356_v46, %v1355_v33  ;;  %v1384_v42 = vmul.f32 %v2355_v61, %v1359_v18  ;;  %v1385_v28 = vmul.f32 %v2356_v46, %v1359_v18  ;;  %v1386_v24 = vmul.f32 %v2355_v61, %v1363_v4 }
 0x190   :  { %v1387_v52 = vmul.f32 %v2356_v46, %v1363_v4  ;;  %v1388_v6 = vadd.f32 %v1372_v34, %v1261_v10  ;;  %v1389_v2 = vadd.f32 %v1373_v26, %v1262_v20  ;;  %v1390_v15 = vadd.f32 %v1374_v45, %v1263_v25  ;;  %v4281_v25 = vld [vmem:[#allocation13_spill] sm:$0xff] }
 0x191   :  { %v1391_v55 = vadd.f32 %v1375_v36, %v3657_v51  ;;  %v1392_v3 = vadd.f32 %v1376_v38, %v1265_v14  ;;  %v1393_v50 = vadd.f32 %v1377_v1, %v3660_v40  ;;  %v1394_v58 = vadd.f32 %v1378_v30, %v1267_v22  ;;  %v4283_v14 = vld [vmem:[#allocation12_spill] sm:$0xff]  ;;  %v4285_v22 = vld [vmem:[#allocation15_spill] sm:$0xff] }
 0x192   :  { %v1395_v54 = vadd.f32 %v1379_v0, %v3663_v48  ;;  %v1396_v37 = vadd.f32 %v1380_v23, %v1269_v60  ;;  %v1397_v16 = vadd.f32 %v1381_v19, %v3666_v62  ;;  %v1398_v29 = vadd.f32 %v1382_v43, %v1271_v35  ;;  %v4287_v60 = vld [vmem:[#allocation14_spill] sm:$0xff]  ;;  %v4289_v35 = vld [vmem:[#allocation17_spill] sm:$0xff] }
 0x193   :  { %v1399_v12 = vadd.f32 %v1383_v31, %v3669_v59  ;;  %v1400_v27 = vadd.f32 %v1384_v42, %v1273_v9  ;;  %v1401_v21 = vadd.f32 %v1385_v28, %v3672_v49  ;;  %v1402_v10 = vadd.f32 %v1386_v24, %v1275_v53  ;;  %v4291_v9 = vld [vmem:[#allocation16_spill] sm:$0xff]  ;;  %v4293_v53 = vld [vmem:[#allocation19_spill] sm:$0xff] }
 0x194   :  { %v1403_v20 = vadd.f32 %v1387_v52, %v3675_v39  ;;  %v4282_v51 = vrot.slane %v4281_v25, 1  ;;  %v4284_v56 = vrot.slane %v4283_v14, 1  ;;  %v4286_v48 = vrot.slane %v4285_v22, 1  ;;  %v4317_v25 = vld [vmem:[#allocation34_spill] sm:$0xff]  ;;  %v4318_v14 = vld [vmem:[#allocation25_spill] sm:$0xff]  ;;  %v4320_v22 = vld [vmem:[#allocation35_spill] sm:$0xff] }
 0x195   :  { %v4288_v32 = vrot.slane %v4287_v60, 1  ;;  %v4290_v59 = vrot.slane %v4289_v35, 1  ;;  %v4292_v44 = vrot.slane %v4291_v9, 1  ;;  %v4294_v39 = vrot.slane %v4293_v53, 1  ;;  %v4321_v60 = vld [vmem:[#allocation26_spill] sm:$0xff]  ;;  %v4323_v35 = vld [vmem:[#allocation36_spill] sm:$0xff] }
 0x196   :  { %v1541_v40 = vsel %vm555_vm4, %v4284_v56, %v4282_v51  ;;  %v4296_v33 = vrot.slane %v4295_v47, 1  ;;  %v1567_v34 = vadd.f32 %v3617_v41, %v1388_v6  ;;  %v4297_v13 = vrot.slane %v4262_v57, 1  ;;  %v4324_v9 = vld [vmem:[#allocation27_spill] sm:$0xff]  ;;  %v4326_v53 = vld [vmem:[#allocation37_spill] sm:$0xff]  ;;  %v4327_v47 = vld [vmem:[#allocation28_spill] sm:$0xff] }
 0x197   :  { %v1544_v62 = vsel %vm555_vm4, %v4288_v32, %v4286_v48  ;;  %v1547_v49 = vsel %vm555_vm4, %v4292_v44, %v4290_v59  ;;  %v1569_v46 = vadd.f32 %v1532_v17, %v1390_v15  ;;  %v4298_v26 = vrot.slane %v4269_v7, 1 }
 0x198   :  { %v1550_v61 = vsel %vm555_vm4, %v4296_v33, %v4294_v39  ;;  %v1568_v18 = vadd.f32 %v4297_v13, %v1389_v2  ;;  %v1571_v4 = vadd.f32 %v1535_v63, %v1392_v3  ;;  %v4299_v36 = vrot.slane %v4273_v5, 1  ;;  %v4308_v2 = vld [vmem:[#allocation31_spill] sm:$0xff] }
 0x199   :  { %v1570_v45 = vadd.f32 %v4298_v26, %v1391_v55  ;;  %v1573_v1 = vadd.f32 %v1538_v8, %v1394_v58  ;;  %v4300_v30 = vrot.slane %v4277_v11, 1  ;;  %v1575_v23 = vadd.f32 %v1541_v40, %v1396_v37  ;;  %v4305_v8 = vld [vmem:[#allocation30_spill] sm:$0xff]  ;;  %v4306_v11 = vld [vmem:[#allocation21_spill] sm:$0xff]  ;;  %v4311_v58 = vld [vmem:[#allocation32_spill] sm:$0xff] }
 0x19a   :  { %v1572_v38 = vadd.f32 %v4299_v36, %v1393_v50  ;;  %v4301_v19 = vmov %v4282_v51  ;;  %v1577_v41 = vadd.f32 %v1544_v62, %v1398_v29  ;;  %v4302_v57 = vmov %v4286_v48  ;;  %v4309_v55 = vld [vmem:[#allocation22_spill] sm:$0xff]  ;;  %v4312_v37 = vld [vmem:[#allocation23_spill] sm:$0xff] }
 0x19b   :  { %v1574_v0 = vadd.f32 %v4300_v30, %v1395_v54  ;;  %v1576_v43 = vadd.f32 %v4301_v19, %v1397_v16  ;;  %v1578_v31 = vadd.f32 %v4302_v57, %v1399_v12  ;;  %v1579_v17 = vadd.f32 %v1547_v49, %v1400_v27  ;;  %v4314_v12 = vld [vmem:[#allocation33_spill] sm:$0xff]  ;;  %v4331_v26 = vld [vmem:[#allocation47_spill] sm:$0xff]  ;;  %v4334_v30 = vld [vmem:[#allocation50_spill] sm:$0xff] }
 0x19c   :  { %v4303_v7 = vmov %v4290_v59  ;;  %v1581_v63 = vadd.f32 %v1550_v61, %v1402_v10  ;;  %v4304_v5 = vmov %v4294_v39  ;;  %v1746_v24 = vadd.f32 %v4305_v8, %v1567_v34  ;;  %v4329_v34 = vld [vmem:[#allocation45_spill] sm:$0xff]  ;;  %v4337_v57 = vld [vmem:[#allocation51_spill] sm:$0xff] }
 0x19d   :  { %v1580_v42 = vadd.f32 %v4303_v7, %v1401_v21  ;;  %v1582_v28 = vadd.f32 %v4304_v5, %v1403_v20  ;;  %v4307_v52 = vrot.slane %v4306_v11, 2  ;;  %v1748_v15 = vadd.f32 %v4308_v2, %v1569_v46  ;;  %v4315_v21 = vld [vmem:[#allocation24_spill] sm:$0xff]  ;;  %v4341_v8 = vld [vmem:[#allocation57_spill] sm:$0xff]  ;;  %v4342_v11 = vld [vmem:[#allocation58_spill] sm:$0xff] }
 0x19e   :  { %v4310_v3 = vrot.slane %v4309_v55, 2  ;;  %v1750_v54 = vadd.f32 %v4311_v58, %v1571_v4  ;;  %v4313_v16 = vrot.slane %v4312_v37, 2  ;;  %v1752_v27 = vadd.f32 %v4314_v12, %v1573_v1  ;;  %v4332_v4 = vld [vmem:[#allocation48_spill] sm:$0xff]  ;;  %v4346_v58 = vld [vmem:[#allocation75_spill] sm:$0xff] }
 0x19f   :  { %v1747_v6 = vadd.f32 %v4307_v52, %v1568_v18  ;;  %v4316_v10 = vrot.slane %v4315_v21, 2  ;;  %v1754_v51 = vadd.f32 %v4317_v25, %v1575_v23  ;;  %v4319_v56 = vrot.slane %v4318_v14, 2  ;;  %v4330_v18 = vld [vmem:[#allocation46_spill] sm:$0xff]  ;;  %v4335_v23 = vld [vmem:[#allocation53_spill] sm:$0xff]  ;;  %v4340_v5 = vld [vmem:[#allocation56_spill] sm:$0xff] }
 0x1a0   :  { %v1749_v50 = vadd.f32 %v4310_v3, %v1570_v45  ;;  %v1751_v29 = vadd.f32 %v4313_v16, %v1572_v38  ;;  %v1756_v48 = vadd.f32 %v4320_v22, %v1577_v41  ;;  %v4322_v32 = vrot.slane %v4321_v60, 2  ;;  %v4333_v38 = vld [vmem:[#allocation49_spill] sm:$0xff]  ;;  %v4345_v3 = vld [vmem:[#allocation83_spill] sm:$0xff]  ;;  %v4348_v16 = vld [vmem:[#allocation84_spill] sm:$0xff] }
 0x1a1   :  { %v1753_v20 = vadd.f32 %v4316_v10, %v1574_v0  ;;  %v1755_v40 = vadd.f32 %v4319_v56, %v1576_v43  ;;  %v1758_v59 = vadd.f32 %v4323_v35, %v1579_v17  ;;  %v4325_v44 = vrot.slane %v4324_v9, 2  ;;  %v4336_v43 = vld [vmem:[#allocation54_spill] sm:$0xff]  ;;  %v4338_v17 = vld [vmem:[#allocation52_spill] sm:$0xff]  ;;  %v4351_v10 = vld [vmem:[#allocation85_spill] sm:$0xff] }
 0x1a2   :  { %v1757_v62 = vadd.f32 %v4322_v32, %v1578_v31  ;;  %v1760_v39 = vadd.f32 %v4326_v53, %v1581_v63  ;;  %v4328_v33 = vrot.slane %v4327_v47, 2  ;;  %v1873_v13 = vadd.f32 %v4329_v34, %v1746_v24  ;;  %v4349_v12 = vld [vmem:[#allocation76_spill] sm:$0xff]  ;;  %v4352_v25 = vld [vmem:[#allocation77_spill] sm:$0xff]  ;;  %v4354_v56 = vld [vmem:[#allocation86_spill] sm:$0xff] }
 0x1a3   :  { %v1759_v49 = vadd.f32 %v4325_v44, %v1580_v42  ;;  %v1874_v46 = vadd.f32 %v4330_v18, %v1747_v6  ;;  %v1875_v45 = vadd.f32 %v4331_v26, %v1748_v15  ;;  %v1876_v36 = vadd.f32 %v4332_v4, %v1749_v50  ;;  %v4339_v42 = vld [vmem:[#allocation55_spill] sm:$0xff]  ;;  %v4344_v15 = vld [vmem:[#allocation60_spill] sm:$0xff]  ;;  %v4355_v22 = vld [vmem:[#allocation78_spill] sm:$0xff] }
 0x1a4   :  { %v1761_v61 = vadd.f32 %v4328_v33, %v1582_v28  ;;  %v1877_v1 = vadd.f32 %v4333_v38, %v1750_v54  ;;  %v1878_v0 = vadd.f32 %v4334_v30, %v1751_v29  ;;  %v1879_v19 = vadd.f32 %v4335_v23, %v1752_v27  ;;  %v4343_v6 = vld [vmem:[#allocation59_spill] sm:$0xff]  ;;  %v4360_v44 = vld [vmem:[#allocation88_spill] sm:$0xff]  ;;  %v4363_v33 = vld [vmem:[#allocation89_spill] sm:$0xff] }
 0x1a5   :  { %v1880_v41 = vadd.f32 %v4336_v43, %v1753_v20  ;;  %v1881_v31 = vadd.f32 %v4337_v57, %v1754_v51  ;;  %v1882_v7 = vadd.f32 %v4338_v17, %v1755_v40  ;;  %v1883_v63 = vadd.f32 %v4339_v42, %v1756_v48  ;;  %v4357_v32 = vld [vmem:[#allocation87_spill] sm:$0xff]  ;;  %v4361_v53 = vld [vmem:[#allocation80_spill] sm:$0xff]  ;;  %v4364_v34 = vld [vmem:[#allocation81_spill] sm:$0xff] }
 0x1a6   :  { %v1884_v28 = vadd.f32 %v4340_v5, %v1757_v62  ;;  %v1885_v24 = vadd.f32 %v4341_v8, %v1758_v59  ;;  %v1886_v52 = vadd.f32 %v4342_v11, %v1759_v49  ;;  %v1887_v2 = vadd.f32 %v4343_v6, %v1760_v39  ;;  %v4358_v35 = vld [vmem:[#allocation79_spill] sm:$0xff]  ;;  %v4369_v38 = vld [vmem:[#allocation117_spill] sm:$0xff] }
 0x1a7   :  { %v1888_v55 = vadd.f32 %v4344_v15, %v1761_v61  ;;  %v2052_v50 = vadd.f32 %v4345_v3, %v1873_v13  ;;  %v4347_v54 = vrot.slane %v4346_v58, 1  ;;  %v2054_v29 = vadd.f32 %v4348_v16, %v1875_v45  ;;  %v4367_v45 = vld [vmem:[#allocation82_spill] sm:$0xff]  ;;  %v4370_v30 = vld [vmem:[#allocation109_spill] sm:$0xff]  ;;  %v4375_v17 = vld [vmem:[#allocation119_spill] sm:$0xff] }
 0x1a8   :  { %v4350_v27 = vrot.slane %v4349_v12, 1  ;;  %v2056_v20 = vadd.f32 %v4351_v10, %v1877_v1  ;;  %v4353_v51 = vrot.slane %v4352_v25, 1  ;;  %v2058_v40 = vadd.f32 %v4354_v56, %v1879_v19  ;;  %v4372_v19 = vld [vmem:[#allocation118_spill] sm:$0xff]  ;;  %v4376_v42 = vld [vmem:[#allocation111_spill] sm:$0xff]  ;;  %v4381_v6 = vld [vmem:[#allocation121_spill] sm:$0xff] }
 0x1a9   :  { %v2053_v37 = vadd.f32 %v4347_v54, %v1874_v46  ;;  %v4356_v48 = vrot.slane %v4355_v22, 1  ;;  %v2060_v62 = vadd.f32 %v4357_v32, %v1881_v31  ;;  %v4359_v59 = vrot.slane %v4358_v35, 1  ;;  %v4366_v46 = vld [vmem:[#allocation90_spill] sm:$0xff]  ;;  %v4382_v15 = vld [vmem:[#allocation112_spill] sm:$0xff] }
 0x1aa   :  { %v2055_v21 = vadd.f32 %v4350_v27, %v1876_v36  ;;  %v2057_v14 = vadd.f32 %v4353_v51, %v1878_v0  ;;  %v2062_v49 = vadd.f32 %v4360_v44, %v1883_v63  ;;  %v4362_v39 = vrot.slane %v4361_v53, 1  ;;  %v4385_v54 = vld [vmem:[#allocation114_spill] sm:$0xff]  ;;  %v4388_v27 = vld [vmem:[#allocation115_spill] sm:$0xff]  ;;  %v4391_v51 = vld [vmem:[#allocation116_spill] sm:$0xff] }
 0x1ab   :  { %v2059_v60 = vadd.f32 %v4356_v48, %v1880_v41  ;;  %v2061_v9 = vadd.f32 %v4359_v59, %v1882_v7  ;;  %v2064_v61 = vadd.f32 %v4363_v33, %v1885_v24  ;;  %v4365_v13 = vrot.slane %v4364_v34, 1  ;;  %v4373_v41 = vld [vmem:[#allocation110_spill] sm:$0xff]  ;;  %v4379_v24 = vld [vmem:[#allocation113_spill] sm:$0xff] }
 0x1ac   :  { %v2063_v47 = vadd.f32 %v4362_v39, %v1884_v28  ;;  %v2066_v26 = vadd.f32 %v4366_v46, %v1887_v2  ;;  %v4368_v4 = vrot.slane %v4367_v45, 1  ;;  %v2231_v1 = vadd.f32 %v4369_v38, %v2052_v50  ;;  %v4378_v28 = vld [vmem:[#allocation120_spill] sm:$0xff]  ;;  %v4384_v50 = vld [vmem:[#allocation122_spill] sm:$0xff] }
 0x1ad   :  { %v2065_v18 = vadd.f32 %v4365_v13, %v1886_v52  ;;  %v4371_v0 = vrot.slane %v4370_v30, 2  ;;  %v2233_v43 = vadd.f32 %v4372_v19, %v2054_v29  ;;  %v4374_v57 = vrot.slane %v4373_v41, 2  ;;  %v4387_v29 = vld [vmem:[#allocation123_spill] sm:$0xff] }
 0x1ae   :  { %v2067_v36 = vadd.f32 %v4368_v4, %v1888_v55  ;;  %v2235_v7 = vadd.f32 %v4375_v17, %v2056_v20  ;;  %v4377_v63 = vrot.slane %v4376_v42, 2  ;;  %v2237_v8 = vadd.f32 %v4378_v28, %v2058_v40  ;;  %2247 = vst [vmem:[%s3917_s3] sm:$0xff] %v2231_v1  ;;  %v4390_v20 = vld [vmem:[#allocation124_spill] sm:$0xff] }
 0x1af   :  { %v2232_v23 = vadd.f32 %v4371_v0, %v2053_v37  ;;  %v2234_v31 = vadd.f32 %v4374_v57, %v2055_v21  ;;  %v4380_v11 = vrot.slane %v4379_v24, 2  ;;  %v2239_v2 = vadd.f32 %v4381_v6, %v2060_v62  ;;  %2249 = vst [vmem:[%s3917_s3 + $0x10] sm:$0xff] %v2233_v43 }
 0x1b0   :  { %v2236_v5 = vadd.f32 %v4377_v63, %v2057_v14  ;;  %v4383_v55 = vrot.slane %v4382_v15, 2  ;;  %v2241_v58 = vadd.f32 %v4384_v50, %v2062_v49  ;;  %v4386_v37 = vrot.slane %v4385_v54, 2  ;;  %2251 = vst [vmem:[%s3917_s3 + $0x20] sm:$0xff] %v2235_v7  ;;  %2253 = vst [vmem:[%s3917_s3 + $0x30] sm:$0xff] %v2237_v8 }
 0x1b1   :  { %v2238_v52 = vadd.f32 %v4380_v11, %v2059_v60  ;;  %2248 = vst [vmem:[%s3917_s3 + $0x8] sm:$0x3f] %v2232_v23  ;;  %v2243_v12 = vadd.f32 %v4387_v29, %v2064_v61  ;;  %v4389_v21 = vrot.slane %v4388_v27, 2  ;;  %2250 = vst [vmem:[%s3917_s3 + $0x18] sm:$0x3f] %v2234_v31  ;;  %v2245_v25 = vadd.f32 %v4390_v20, %v2066_v26 }
 0x1b2   :  { %v2240_v3 = vadd.f32 %v4383_v55, %v2061_v9  ;;  %v2242_v16 = vadd.f32 %v4386_v37, %v2063_v47  ;;  %2252 = vst [vmem:[%s3917_s3 + $0x28] sm:$0x3f] %v2236_v5  ;;  %v4392_v14 = vrot.slane %v4391_v51, 2  ;;  %2255 = vst [vmem:[%s3917_s3 + $0x40] sm:$0xff] %v2239_v2 }
 0x1b3   :  { %v2244_v10 = vadd.f32 %v4389_v21, %v2065_v18  ;;  %2254 = vst [vmem:[%s3917_s3 + $0x38] sm:$0x3f] %v2238_v52  ;;  %2257 = vst [vmem:[%s3917_s3 + $0x50] sm:$0xff] %v2241_v58 }
 0x1b4   :  { %v2246_v56 = vadd.f32 %v4392_v14, %v2067_v36  ;;  %2256 = vst [vmem:[%s3917_s3 + $0x48] sm:$0x3f] %v2240_v3  ;;  %2258 = vst [vmem:[%s3917_s3 + $0x58] sm:$0x3f] %v2242_v16 }
 0x1b5   :  { %2259 = vst [vmem:[%s3917_s3 + $0x60] sm:$0xff] %v2243_v12  ;;  %2260 = vst [vmem:[%s3917_s3 + $0x68] sm:$0x3f] %v2244_v10 }
 0x1b6   :  { %2261 = vst [vmem:[%s3917_s3 + $0x70] sm:$0xff] %v2245_v25  ;;  %2262 = vst [vmem:[%s3917_s3 + $0x78] sm:$0x3f] %v2246_v56 }

</bundles_post_ra>
